<compile_context>
chip_gen: v7x
topology: tpu7x:2x2x1
jax: 0.10.0
libtpu: 0.0.40
codegen_flags: <defaults>
</compile_context>

<pallas_src>
import jax
import jax.numpy as jnp
from jax.experimental import pallas as pl
from jax.experimental.pallas import tpu as pltpu


_LAYER_DIMS = ((15, 8), (8, 5), (5, 3))   # (fan_in, fan_out) per layer
_BIAS_COL = 15                            # bias lives at k == 15 of each packed row
_LAYER_STRIDE = 8 * 16                    # 128 floats per layer in the flat params
_ROW_STRIDE = 16                          # 16 floats per output row (15 w + 1 b)


def _round_up(n, m):
    return ((n + m - 1) // m) * m


def n2brain_kernel(params_ref, x_ref, out_ref):
    """params_ref: f32[384] (SMEM), x_ref: f32[15, R, 128], out_ref: f32[3, R, 128]."""

    def w(layer, j, k):
        return params_ref[layer * _LAYER_STRIDE + j * _ROW_STRIDE + k]

    def b(layer, j):
        return params_ref[layer * _LAYER_STRIDE + j * _ROW_STRIDE + _BIAS_COL]

    def dense(h_rows, layer, n_out):
        # h_rows: list of n_in arrays, each [R, 128].  Fully unrolled
        # scalar x vreg accumulation; bias folded into the first FMA.
        n_in = len(h_rows)
        outs = []
        for j in range(n_out):
            acc = h_rows[0] * w(layer, j, 0) + b(layer, j)
            for k in range(1, n_in):
                acc = acc + h_rows[k] * w(layer, j, k)
            outs.append(acc)
        return outs

    def sigmoid(z):
        # exp + approx reciprocal both run on the EUP slot (idle otherwise);
        # approx error (~2^-12) is far below the test tolerance.
        return pl.reciprocal(1.0 + jnp.exp(-z), approx=True)

    x_rows = [x_ref[k] for k in range(15)]           # 15 lane-dense [R,128] loads

    h1 = [sigmoid(z) for z in dense(x_rows, 0, 8)]   # Linear(15, 8) + sigmoid
    # TODO(synk): self.midle[0] = x.tolist() is a host-side Python list side effect; no kernel equivalent.
    h2 = [sigmoid(z) for z in dense(h1, 1, 5)]       # Linear(8, 5) + sigmoid
    # TODO(synk): self.midle[1] = x.tolist() is a host-side Python list side effect; no kernel equivalent.
    out = dense(h2, 2, 3)                            # Linear(5, 3), no activation

    for j in range(3):
        out_ref[j] = out[j]


def n2brain_forward_fm(x_fm, params_flat, *, tile_b=65536):
    """Feature-major entry point: x_fm [15, B] f32 -> [3, B] f32."""
    n_in, B = x_fm.shape
    assert n_in == 15 and params_flat.shape == (384,)

    # tb must be a multiple of 1024 so the (tb//128, 128) trailing block dims
    # satisfy the (8, 128) divisibility constraint.
    b_ceil = _round_up(B, 1024)
    tb = min(_round_up(tile_b, 1024), b_ceil)
    # Keep >= 4 grid steps when the batch is big enough: v7x's two TensorCores
    # only get work via the "parallel" grid axis (no cost on single-TC v5e/v6e).
    if b_ceil >= 4 * 1024:
        tb = min(tb, _round_up((b_ceil + 3) // 4, 1024))

    b_pad = _round_up(B, tb)
    grid_n = b_pad // tb
    r_total = b_pad // 128
    r_tile = tb // 128

    if b_pad != B:
        x_fm = jnp.pad(x_fm, ((0, 0), (0, b_pad - B)))
    x_blocked = x_fm.reshape(15, r_total, 128)        # free trailing-dim split

    out_blocked = pl.pallas_call(
        n2brain_kernel,
        out_shape=jax.ShapeDtypeStruct((3, r_total, 128), jnp.float32),
        grid=(grid_n,),
        in_specs=[
            # 48 weights + biases as SMEM scalars (resident, no VMEM broadcasts).
            pl.BlockSpec(memory_space=pltpu.MemorySpace.SMEM),
            # Batch tile of x, vreg-dense: (15, tb//128, 128).
            pl.BlockSpec((15, r_tile, 128), lambda i: (0, i, 0)),
        ],
        out_specs=pl.BlockSpec((3, r_tile, 128), lambda i: (0, i, 0)),
        compiler_params=pltpu.CompilerParams(
            dimension_semantics=("parallel",),         # megacore batch split on v7x
            vmem_limit_bytes=32 * 1024 * 1024,         # tiny footprint, fits all gens
        ),
    )(params_flat, x_blocked)

    return out_blocked.reshape(3, b_pad)[:, :B]


def n2brain_forward(x, params_flat, *, tile_b=65536):
    """Row-major convenience wrapper: x [B, 15] f32 -> [B, 3] f32.

    The transpose here is pure layout plumbing; performance-critical callers
    (esp. on v5e) should feed feature-major data to n2brain_forward_fm directly.
    """
    return n2brain_forward_fm(x.T, params_flat, tile_b=tile_b).T


def init_params(key):
    """torch.nn.Linear-style init: W [out, in], b [out], U(-1/sqrt(in), 1/sqrt(in))."""
    raw = []
    for fan_in, fan_out in _LAYER_DIMS:
        key, kw, kb = jax.random.split(key, 3)
        bound = 1.0 / (fan_in ** 0.5)
        w = jax.random.uniform(kw, (fan_out, fan_in), jnp.float32, -bound, bound)
        b = jax.random.uniform(kb, (fan_out,), jnp.float32, -bound, bound)
        raw.append((w, b))
    return tuple(raw)


def pack_params(raw_params):
    """Pack the three (W, b) pairs into one flat f32[384] array.

    Layout: idx = layer*128 + out_row*16 + k, weights in k=0..fan_in-1,
    bias at k=15.
    """
    packed = jnp.zeros((3, 8, 16), jnp.float32)
    for l, (w, b) in enumerate(raw_params):
        o, i = w.shape
        packed = packed.at[l, :o, :i].set(w)
        packed = packed.at[l, :o, _BIAS_COL].set(b)
    return packed.reshape(-1)


def n2brain_reference(x, raw_params):
    (w1, b1), (w2, b2), (w3, b3) = raw_params
    h1 = jax.nn.sigmoid(x @ w1.T + b1)
    h2 = jax.nn.sigmoid(h1 @ w2.T + b2)
    return h2 @ w3.T + b3


if __name__ == "__main__":
    key = jax.random.PRNGKey(0)
    key, kx1, kx2 = jax.random.split(key, 3)

    raw_params = init_params(key)
    params_flat = pack_params(raw_params)

    # Small batch (single tile).
    x_small = jax.random.normal(kx1, (8, 15), jnp.float32)
    out_small = jax.block_until_ready(n2brain_forward(x_small, params_flat))
    ref_small = n2brain_reference(x_small, raw_params)
    assert out_small.shape == (8, 3)
    assert jnp.allclose(out_small, ref_small, atol=2e-3, rtol=2e-3), "mismatch (small batch)"

    # Batch not divisible by the tile -> exercises padding + grid > 1 pipelining.
    x_big = jax.random.normal(kx2, (2500, 15), jnp.float32)
    out_big = jax.block_until_ready(n2brain_forward(x_big, params_flat, tile_b=1024))
    ref_big = n2brain_reference(x_big, raw_params)
    assert out_big.shape == (2500, 3)
    assert jnp.allclose(out_big, ref_big, atol=2e-3, rtol=2e-3), "mismatch (tiled batch)"

    print("KERNEL_OK")
</pallas_src>

<mosaic_0001>
module attributes {stable_mosaic.version = 11 : i64} {
  func.func @n2brain_kernel(%arg0: i32, %arg1: memref<384xf32, #tpu.memory_space<smem>>, %arg2: memref<15x8x128xf32, #tpu.memory_space<vmem>>, %arg3: memref<3x8x128xf32, #tpu.memory_space<vmem>>) attributes {dimension_semantics = [#tpu.dimension_semantics<parallel>], iteration_bounds = array<i64: 1>, scalar_prefetch = 0 : i64, scratch_operands = 0 : i64, tpu.core_type = #tpu.core_type<tc>, window_params = [{transform_indices = @transform_0, window_bounds = array<i64: 384>}, {transform_indices = @transform_1, window_bounds = array<i64: 15, 8, 128>}, {transform_indices = @transform_2, window_bounds = array<i64: 3, 8, 128>}]} {
    %c0 = arith.constant 0 : index
    %c0_0 = arith.constant 0 : index
    %c0_1 = arith.constant 0 : index
    %0 = vector.load %arg2[%c0, %c0_0, %c0_1] : memref<15x8x128xf32, #tpu.memory_space<vmem>>, vector<1x8x128xf32>
    %1 = vector.shape_cast %0 : vector<1x8x128xf32> to vector<8x128xf32>
    %c1 = arith.constant 1 : index
    %c0_2 = arith.constant 0 : index
    %c0_3 = arith.constant 0 : index
    %2 = vector.load %arg2[%c1, %c0_2, %c0_3] : memref<15x8x128xf32, #tpu.memory_space<vmem>>, vector<1x8x128xf32>
    %3 = vector.shape_cast %2 : vector<1x8x128xf32> to vector<8x128xf32>
    %c2 = arith.constant 2 : index
    %c0_4 = arith.constant 0 : index
    %c0_5 = arith.constant 0 : index
    %4 = vector.load %arg2[%c2, %c0_4, %c0_5] : memref<15x8x128xf32, #tpu.memory_space<vmem>>, vector<1x8x128xf32>
    %5 = vector.shape_cast %4 : vector<1x8x128xf32> to vector<8x128xf32>
    %c3 = arith.constant 3 : index
    %c0_6 = arith.constant 0 : index
    %c0_7 = arith.constant 0 : index
    %6 = vector.load %arg2[%c3, %c0_6, %c0_7] : memref<15x8x128xf32, #tpu.memory_space<vmem>>, vector<1x8x128xf32>
    %7 = vector.shape_cast %6 : vector<1x8x128xf32> to vector<8x128xf32>
    %c4 = arith.constant 4 : index
    %c0_8 = arith.constant 0 : index
    %c0_9 = arith.constant 0 : index
    %8 = vector.load %arg2[%c4, %c0_8, %c0_9] : memref<15x8x128xf32, #tpu.memory_space<vmem>>, vector<1x8x128xf32>
    %9 = vector.shape_cast %8 : vector<1x8x128xf32> to vector<8x128xf32>
    %c5 = arith.constant 5 : index
    %c0_10 = arith.constant 0 : index
    %c0_11 = arith.constant 0 : index
    %10 = vector.load %arg2[%c5, %c0_10, %c0_11] : memref<15x8x128xf32, #tpu.memory_space<vmem>>, vector<1x8x128xf32>
    %11 = vector.shape_cast %10 : vector<1x8x128xf32> to vector<8x128xf32>
    %c6 = arith.constant 6 : index
    %c0_12 = arith.constant 0 : index
    %c0_13 = arith.constant 0 : index
    %12 = vector.load %arg2[%c6, %c0_12, %c0_13] : memref<15x8x128xf32, #tpu.memory_space<vmem>>, vector<1x8x128xf32>
    %13 = vector.shape_cast %12 : vector<1x8x128xf32> to vector<8x128xf32>
    %c7 = arith.constant 7 : index
    %c0_14 = arith.constant 0 : index
    %c0_15 = arith.constant 0 : index
    %14 = vector.load %arg2[%c7, %c0_14, %c0_15] : memref<15x8x128xf32, #tpu.memory_space<vmem>>, vector<1x8x128xf32>
    %15 = vector.shape_cast %14 : vector<1x8x128xf32> to vector<8x128xf32>
    %c8 = arith.constant 8 : index
    %c0_16 = arith.constant 0 : index
    %c0_17 = arith.constant 0 : index
    %16 = vector.load %arg2[%c8, %c0_16, %c0_17] : memref<15x8x128xf32, #tpu.memory_space<vmem>>, vector<1x8x128xf32>
    %17 = vector.shape_cast %16 : vector<1x8x128xf32> to vector<8x128xf32>
    %c9 = arith.constant 9 : index
    %c0_18 = arith.constant 0 : index
    %c0_19 = arith.constant 0 : index
    %18 = vector.load %arg2[%c9, %c0_18, %c0_19] : memref<15x8x128xf32, #tpu.memory_space<vmem>>, vector<1x8x128xf32>
    %19 = vector.shape_cast %18 : vector<1x8x128xf32> to vector<8x128xf32>
    %c10 = arith.constant 10 : index
    %c0_20 = arith.constant 0 : index
    %c0_21 = arith.constant 0 : index
    %20 = vector.load %arg2[%c10, %c0_20, %c0_21] : memref<15x8x128xf32, #tpu.memory_space<vmem>>, vector<1x8x128xf32>
    %21 = vector.shape_cast %20 : vector<1x8x128xf32> to vector<8x128xf32>
    %c11 = arith.constant 11 : index
    %c0_22 = arith.constant 0 : index
    %c0_23 = arith.constant 0 : index
    %22 = vector.load %arg2[%c11, %c0_22, %c0_23] : memref<15x8x128xf32, #tpu.memory_space<vmem>>, vector<1x8x128xf32>
    %23 = vector.shape_cast %22 : vector<1x8x128xf32> to vector<8x128xf32>
    %c12 = arith.constant 12 : index
    %c0_24 = arith.constant 0 : index
    %c0_25 = arith.constant 0 : index
    %24 = vector.load %arg2[%c12, %c0_24, %c0_25] : memref<15x8x128xf32, #tpu.memory_space<vmem>>, vector<1x8x128xf32>
    %25 = vector.shape_cast %24 : vector<1x8x128xf32> to vector<8x128xf32>
    %c13 = arith.constant 13 : index
    %c0_26 = arith.constant 0 : index
    %c0_27 = arith.constant 0 : index
    %26 = vector.load %arg2[%c13, %c0_26, %c0_27] : memref<15x8x128xf32, #tpu.memory_space<vmem>>, vector<1x8x128xf32>
    %27 = vector.shape_cast %26 : vector<1x8x128xf32> to vector<8x128xf32>
    %c14 = arith.constant 14 : index
    %c0_28 = arith.constant 0 : index
    %c0_29 = arith.constant 0 : index
    %28 = vector.load %arg2[%c14, %c0_28, %c0_29] : memref<15x8x128xf32, #tpu.memory_space<vmem>>, vector<1x8x128xf32>
    %29 = vector.shape_cast %28 : vector<1x8x128xf32> to vector<8x128xf32>
    %c0_30 = arith.constant 0 : index
    %30 = memref.load %arg1[%c0_30] : memref<384xf32, #tpu.memory_space<smem>>
    %31 = vector.broadcast %30 : f32 to vector<8x128xf32>
    %32 = arith.mulf %1, %31 : vector<8x128xf32>
    %c15 = arith.constant 15 : index
    %33 = memref.load %arg1[%c15] : memref<384xf32, #tpu.memory_space<smem>>
    %34 = vector.broadcast %33 : f32 to vector<8x128xf32>
    %35 = arith.addf %32, %34 : vector<8x128xf32>
    %c1_31 = arith.constant 1 : index
    %36 = memref.load %arg1[%c1_31] : memref<384xf32, #tpu.memory_space<smem>>
    %37 = vector.broadcast %36 : f32 to vector<8x128xf32>
    %38 = arith.mulf %3, %37 : vector<8x128xf32>
    %39 = arith.addf %35, %38 : vector<8x128xf32>
    %c2_32 = arith.constant 2 : index
    %40 = memref.load %arg1[%c2_32] : memref<384xf32, #tpu.memory_space<smem>>
    %41 = vector.broadcast %40 : f32 to vector<8x128xf32>
    %42 = arith.mulf %5, %41 : vector<8x128xf32>
    %43 = arith.addf %39, %42 : vector<8x128xf32>
    %c3_33 = arith.constant 3 : index
    %44 = memref.load %arg1[%c3_33] : memref<384xf32, #tpu.memory_space<smem>>
    %45 = vector.broadcast %44 : f32 to vector<8x128xf32>
    %46 = arith.mulf %7, %45 : vector<8x128xf32>
    %47 = arith.addf %43, %46 : vector<8x128xf32>
    %c4_34 = arith.constant 4 : index
    %48 = memref.load %arg1[%c4_34] : memref<384xf32, #tpu.memory_space<smem>>
    %49 = vector.broadcast %48 : f32 to vector<8x128xf32>
    %50 = arith.mulf %9, %49 : vector<8x128xf32>
    %51 = arith.addf %47, %50 : vector<8x128xf32>
    %c5_35 = arith.constant 5 : index
    %52 = memref.load %arg1[%c5_35] : memref<384xf32, #tpu.memory_space<smem>>
    %53 = vector.broadcast %52 : f32 to vector<8x128xf32>
    %54 = arith.mulf %11, %53 : vector<8x128xf32>
    %55 = arith.addf %51, %54 : vector<8x128xf32>
    %c6_36 = arith.constant 6 : index
    %56 = memref.load %arg1[%c6_36] : memref<384xf32, #tpu.memory_space<smem>>
    %57 = vector.broadcast %56 : f32 to vector<8x128xf32>
    %58 = arith.mulf %13, %57 : vector<8x128xf32>
    %59 = arith.addf %55, %58 : vector<8x128xf32>
    %c7_37 = arith.constant 7 : index
    %60 = memref.load %arg1[%c7_37] : memref<384xf32, #tpu.memory_space<smem>>
    %61 = vector.broadcast %60 : f32 to vector<8x128xf32>
    %62 = arith.mulf %15, %61 : vector<8x128xf32>
    %63 = arith.addf %59, %62 : vector<8x128xf32>
    %c8_38 = arith.constant 8 : index
    %64 = memref.load %arg1[%c8_38] : memref<384xf32, #tpu.memory_space<smem>>
    %65 = vector.broadcast %64 : f32 to vector<8x128xf32>
    %66 = arith.mulf %17, %65 : vector<8x128xf32>
    %67 = arith.addf %63, %66 : vector<8x128xf32>
    %c9_39 = arith.constant 9 : index
    %68 = memref.load %arg1[%c9_39] : memref<384xf32, #tpu.memory_space<smem>>
    %69 = vector.broadcast %68 : f32 to vector<8x128xf32>
    %70 = arith.mulf %19, %69 : vector<8x128xf32>
    %71 = arith.addf %67, %70 : vector<8x128xf32>
    %c10_40 = arith.constant 10 : index
    %72 = memref.load %arg1[%c10_40] : memref<384xf32, #tpu.memory_space<smem>>
    %73 = vector.broadcast %72 : f32 to vector<8x128xf32>
    %74 = arith.mulf %21, %73 : vector<8x128xf32>
    %75 = arith.addf %71, %74 : vector<8x128xf32>
    %c11_41 = arith.constant 11 : index
    %76 = memref.load %arg1[%c11_41] : memref<384xf32, #tpu.memory_space<smem>>
    %77 = vector.broadcast %76 : f32 to vector<8x128xf32>
    %78 = arith.mulf %23, %77 : vector<8x128xf32>
    %79 = arith.addf %75, %78 : vector<8x128xf32>
    %c12_42 = arith.constant 12 : index
    %80 = memref.load %arg1[%c12_42] : memref<384xf32, #tpu.memory_space<smem>>
    %81 = vector.broadcast %80 : f32 to vector<8x128xf32>
    %82 = arith.mulf %25, %81 : vector<8x128xf32>
    %83 = arith.addf %79, %82 : vector<8x128xf32>
    %c13_43 = arith.constant 13 : index
    %84 = memref.load %arg1[%c13_43] : memref<384xf32, #tpu.memory_space<smem>>
    %85 = vector.broadcast %84 : f32 to vector<8x128xf32>
    %86 = arith.mulf %27, %85 : vector<8x128xf32>
    %87 = arith.addf %83, %86 : vector<8x128xf32>
    %c14_44 = arith.constant 14 : index
    %88 = memref.load %arg1[%c14_44] : memref<384xf32, #tpu.memory_space<smem>>
    %89 = vector.broadcast %88 : f32 to vector<8x128xf32>
    %90 = arith.mulf %29, %89 : vector<8x128xf32>
    %91 = arith.addf %87, %90 : vector<8x128xf32>
    %c16 = arith.constant 16 : index
    %92 = memref.load %arg1[%c16] : memref<384xf32, #tpu.memory_space<smem>>
    %93 = vector.broadcast %92 : f32 to vector<8x128xf32>
    %94 = arith.mulf %1, %93 : vector<8x128xf32>
    %c31 = arith.constant 31 : index
    %95 = memref.load %arg1[%c31] : memref<384xf32, #tpu.memory_space<smem>>
    %96 = vector.broadcast %95 : f32 to vector<8x128xf32>
    %97 = arith.addf %94, %96 : vector<8x128xf32>
    %c17 = arith.constant 17 : index
    %98 = memref.load %arg1[%c17] : memref<384xf32, #tpu.memory_space<smem>>
    %99 = vector.broadcast %98 : f32 to vector<8x128xf32>
    %100 = arith.mulf %3, %99 : vector<8x128xf32>
    %101 = arith.addf %97, %100 : vector<8x128xf32>
    %c18 = arith.constant 18 : index
    %102 = memref.load %arg1[%c18] : memref<384xf32, #tpu.memory_space<smem>>
    %103 = vector.broadcast %102 : f32 to vector<8x128xf32>
    %104 = arith.mulf %5, %103 : vector<8x128xf32>
    %105 = arith.addf %101, %104 : vector<8x128xf32>
    %c19 = arith.constant 19 : index
    %106 = memref.load %arg1[%c19] : memref<384xf32, #tpu.memory_space<smem>>
    %107 = vector.broadcast %106 : f32 to vector<8x128xf32>
    %108 = arith.mulf %7, %107 : vector<8x128xf32>
    %109 = arith.addf %105, %108 : vector<8x128xf32>
    %c20 = arith.constant 20 : index
    %110 = memref.load %arg1[%c20] : memref<384xf32, #tpu.memory_space<smem>>
    %111 = vector.broadcast %110 : f32 to vector<8x128xf32>
    %112 = arith.mulf %9, %111 : vector<8x128xf32>
    %113 = arith.addf %109, %112 : vector<8x128xf32>
    %c21 = arith.constant 21 : index
    %114 = memref.load %arg1[%c21] : memref<384xf32, #tpu.memory_space<smem>>
    %115 = vector.broadcast %114 : f32 to vector<8x128xf32>
    %116 = arith.mulf %11, %115 : vector<8x128xf32>
    %117 = arith.addf %113, %116 : vector<8x128xf32>
    %c22 = arith.constant 22 : index
    %118 = memref.load %arg1[%c22] : memref<384xf32, #tpu.memory_space<smem>>
    %119 = vector.broadcast %118 : f32 to vector<8x128xf32>
    %120 = arith.mulf %13, %119 : vector<8x128xf32>
    %121 = arith.addf %117, %120 : vector<8x128xf32>
    %c23 = arith.constant 23 : index
    %122 = memref.load %arg1[%c23] : memref<384xf32, #tpu.memory_space<smem>>
    %123 = vector.broadcast %122 : f32 to vector<8x128xf32>
    %124 = arith.mulf %15, %123 : vector<8x128xf32>
    %125 = arith.addf %121, %124 : vector<8x128xf32>
    %c24 = arith.constant 24 : index
    %126 = memref.load %arg1[%c24] : memref<384xf32, #tpu.memory_space<smem>>
    %127 = vector.broadcast %126 : f32 to vector<8x128xf32>
    %128 = arith.mulf %17, %127 : vector<8x128xf32>
    %129 = arith.addf %125, %128 : vector<8x128xf32>
    %c25 = arith.constant 25 : index
    %130 = memref.load %arg1[%c25] : memref<384xf32, #tpu.memory_space<smem>>
    %131 = vector.broadcast %130 : f32 to vector<8x128xf32>
    %132 = arith.mulf %19, %131 : vector<8x128xf32>
    %133 = arith.addf %129, %132 : vector<8x128xf32>
    %c26 = arith.constant 26 : index
    %134 = memref.load %arg1[%c26] : memref<384xf32, #tpu.memory_space<smem>>
    %135 = vector.broadcast %134 : f32 to vector<8x128xf32>
    %136 = arith.mulf %21, %135 : vector<8x128xf32>
    %137 = arith.addf %133, %136 : vector<8x128xf32>
    %c27 = arith.constant 27 : index
    %138 = memref.load %arg1[%c27] : memref<384xf32, #tpu.memory_space<smem>>
    %139 = vector.broadcast %138 : f32 to vector<8x128xf32>
    %140 = arith.mulf %23, %139 : vector<8x128xf32>
    %141 = arith.addf %137, %140 : vector<8x128xf32>
    %c28 = arith.constant 28 : index
    %142 = memref.load %arg1[%c28] : memref<384xf32, #tpu.memory_space<smem>>
    %143 = vector.broadcast %142 : f32 to vector<8x128xf32>
    %144 = arith.mulf %25, %143 : vector<8x128xf32>
    %145 = arith.addf %141, %144 : vector<8x128xf32>
    %c29 = arith.constant 29 : index
    %146 = memref.load %arg1[%c29] : memref<384xf32, #tpu.memory_space<smem>>
    %147 = vector.broadcast %146 : f32 to vector<8x128xf32>
    %148 = arith.mulf %27, %147 : vector<8x128xf32>
    %149 = arith.addf %145, %148 : vector<8x128xf32>
    %c30 = arith.constant 30 : index
    %150 = memref.load %arg1[%c30] : memref<384xf32, #tpu.memory_space<smem>>
    %151 = vector.broadcast %150 : f32 to vector<8x128xf32>
    %152 = arith.mulf %29, %151 : vector<8x128xf32>
    %153 = arith.addf %149, %152 : vector<8x128xf32>
    %c32 = arith.constant 32 : index
    %154 = memref.load %arg1[%c32] : memref<384xf32, #tpu.memory_space<smem>>
    %155 = vector.broadcast %154 : f32 to vector<8x128xf32>
    %156 = arith.mulf %1, %155 : vector<8x128xf32>
    %c47 = arith.constant 47 : index
    %157 = memref.load %arg1[%c47] : memref<384xf32, #tpu.memory_space<smem>>
    %158 = vector.broadcast %157 : f32 to vector<8x128xf32>
    %159 = arith.addf %156, %158 : vector<8x128xf32>
    %c33 = arith.constant 33 : index
    %160 = memref.load %arg1[%c33] : memref<384xf32, #tpu.memory_space<smem>>
    %161 = vector.broadcast %160 : f32 to vector<8x128xf32>
    %162 = arith.mulf %3, %161 : vector<8x128xf32>
    %163 = arith.addf %159, %162 : vector<8x128xf32>
    %c34 = arith.constant 34 : index
    %164 = memref.load %arg1[%c34] : memref<384xf32, #tpu.memory_space<smem>>
    %165 = vector.broadcast %164 : f32 to vector<8x128xf32>
    %166 = arith.mulf %5, %165 : vector<8x128xf32>
    %167 = arith.addf %163, %166 : vector<8x128xf32>
    %c35 = arith.constant 35 : index
    %168 = memref.load %arg1[%c35] : memref<384xf32, #tpu.memory_space<smem>>
    %169 = vector.broadcast %168 : f32 to vector<8x128xf32>
    %170 = arith.mulf %7, %169 : vector<8x128xf32>
    %171 = arith.addf %167, %170 : vector<8x128xf32>
    %c36 = arith.constant 36 : index
    %172 = memref.load %arg1[%c36] : memref<384xf32, #tpu.memory_space<smem>>
    %173 = vector.broadcast %172 : f32 to vector<8x128xf32>
    %174 = arith.mulf %9, %173 : vector<8x128xf32>
    %175 = arith.addf %171, %174 : vector<8x128xf32>
    %c37 = arith.constant 37 : index
    %176 = memref.load %arg1[%c37] : memref<384xf32, #tpu.memory_space<smem>>
    %177 = vector.broadcast %176 : f32 to vector<8x128xf32>
    %178 = arith.mulf %11, %177 : vector<8x128xf32>
    %179 = arith.addf %175, %178 : vector<8x128xf32>
    %c38 = arith.constant 38 : index
    %180 = memref.load %arg1[%c38] : memref<384xf32, #tpu.memory_space<smem>>
    %181 = vector.broadcast %180 : f32 to vector<8x128xf32>
    %182 = arith.mulf %13, %181 : vector<8x128xf32>
    %183 = arith.addf %179, %182 : vector<8x128xf32>
    %c39 = arith.constant 39 : index
    %184 = memref.load %arg1[%c39] : memref<384xf32, #tpu.memory_space<smem>>
    %185 = vector.broadcast %184 : f32 to vector<8x128xf32>
    %186 = arith.mulf %15, %185 : vector<8x128xf32>
    %187 = arith.addf %183, %186 : vector<8x128xf32>
    %c40 = arith.constant 40 : index
    %188 = memref.load %arg1[%c40] : memref<384xf32, #tpu.memory_space<smem>>
    %189 = vector.broadcast %188 : f32 to vector<8x128xf32>
    %190 = arith.mulf %17, %189 : vector<8x128xf32>
    %191 = arith.addf %187, %190 : vector<8x128xf32>
    %c41 = arith.constant 41 : index
    %192 = memref.load %arg1[%c41] : memref<384xf32, #tpu.memory_space<smem>>
    %193 = vector.broadcast %192 : f32 to vector<8x128xf32>
    %194 = arith.mulf %19, %193 : vector<8x128xf32>
    %195 = arith.addf %191, %194 : vector<8x128xf32>
    %c42 = arith.constant 42 : index
    %196 = memref.load %arg1[%c42] : memref<384xf32, #tpu.memory_space<smem>>
    %197 = vector.broadcast %196 : f32 to vector<8x128xf32>
    %198 = arith.mulf %21, %197 : vector<8x128xf32>
    %199 = arith.addf %195, %198 : vector<8x128xf32>
    %c43 = arith.constant 43 : index
    %200 = memref.load %arg1[%c43] : memref<384xf32, #tpu.memory_space<smem>>
    %201 = vector.broadcast %200 : f32 to vector<8x128xf32>
    %202 = arith.mulf %23, %201 : vector<8x128xf32>
    %203 = arith.addf %199, %202 : vector<8x128xf32>
    %c44 = arith.constant 44 : index
    %204 = memref.load %arg1[%c44] : memref<384xf32, #tpu.memory_space<smem>>
    %205 = vector.broadcast %204 : f32 to vector<8x128xf32>
    %206 = arith.mulf %25, %205 : vector<8x128xf32>
    %207 = arith.addf %203, %206 : vector<8x128xf32>
    %c45 = arith.constant 45 : index
    %208 = memref.load %arg1[%c45] : memref<384xf32, #tpu.memory_space<smem>>
    %209 = vector.broadcast %208 : f32 to vector<8x128xf32>
    %210 = arith.mulf %27, %209 : vector<8x128xf32>
    %211 = arith.addf %207, %210 : vector<8x128xf32>
    %c46 = arith.constant 46 : index
    %212 = memref.load %arg1[%c46] : memref<384xf32, #tpu.memory_space<smem>>
    %213 = vector.broadcast %212 : f32 to vector<8x128xf32>
    %214 = arith.mulf %29, %213 : vector<8x128xf32>
    %215 = arith.addf %211, %214 : vector<8x128xf32>
    %c48 = arith.constant 48 : index
    %216 = memref.load %arg1[%c48] : memref<384xf32, #tpu.memory_space<smem>>
    %217 = vector.broadcast %216 : f32 to vector<8x128xf32>
    %218 = arith.mulf %1, %217 : vector<8x128xf32>
    %c63 = arith.constant 63 : index
    %219 = memref.load %arg1[%c63] : memref<384xf32, #tpu.memory_space<smem>>
    %220 = vector.broadcast %219 : f32 to vector<8x128xf32>
    %221 = arith.addf %218, %220 : vector<8x128xf32>
    %c49 = arith.constant 49 : index
    %222 = memref.load %arg1[%c49] : memref<384xf32, #tpu.memory_space<smem>>
    %223 = vector.broadcast %222 : f32 to vector<8x128xf32>
    %224 = arith.mulf %3, %223 : vector<8x128xf32>
    %225 = arith.addf %221, %224 : vector<8x128xf32>
    %c50 = arith.constant 50 : index
    %226 = memref.load %arg1[%c50] : memref<384xf32, #tpu.memory_space<smem>>
    %227 = vector.broadcast %226 : f32 to vector<8x128xf32>
    %228 = arith.mulf %5, %227 : vector<8x128xf32>
    %229 = arith.addf %225, %228 : vector<8x128xf32>
    %c51 = arith.constant 51 : index
    %230 = memref.load %arg1[%c51] : memref<384xf32, #tpu.memory_space<smem>>
    %231 = vector.broadcast %230 : f32 to vector<8x128xf32>
    %232 = arith.mulf %7, %231 : vector<8x128xf32>
    %233 = arith.addf %229, %232 : vector<8x128xf32>
    %c52 = arith.constant 52 : index
    %234 = memref.load %arg1[%c52] : memref<384xf32, #tpu.memory_space<smem>>
    %235 = vector.broadcast %234 : f32 to vector<8x128xf32>
    %236 = arith.mulf %9, %235 : vector<8x128xf32>
    %237 = arith.addf %233, %236 : vector<8x128xf32>
    %c53 = arith.constant 53 : index
    %238 = memref.load %arg1[%c53] : memref<384xf32, #tpu.memory_space<smem>>
    %239 = vector.broadcast %238 : f32 to vector<8x128xf32>
    %240 = arith.mulf %11, %239 : vector<8x128xf32>
    %241 = arith.addf %237, %240 : vector<8x128xf32>
    %c54 = arith.constant 54 : index
    %242 = memref.load %arg1[%c54] : memref<384xf32, #tpu.memory_space<smem>>
    %243 = vector.broadcast %242 : f32 to vector<8x128xf32>
    %244 = arith.mulf %13, %243 : vector<8x128xf32>
    %245 = arith.addf %241, %244 : vector<8x128xf32>
    %c55 = arith.constant 55 : index
    %246 = memref.load %arg1[%c55] : memref<384xf32, #tpu.memory_space<smem>>
    %247 = vector.broadcast %246 : f32 to vector<8x128xf32>
    %248 = arith.mulf %15, %247 : vector<8x128xf32>
    %249 = arith.addf %245, %248 : vector<8x128xf32>
    %c56 = arith.constant 56 : index
    %250 = memref.load %arg1[%c56] : memref<384xf32, #tpu.memory_space<smem>>
    %251 = vector.broadcast %250 : f32 to vector<8x128xf32>
    %252 = arith.mulf %17, %251 : vector<8x128xf32>
    %253 = arith.addf %249, %252 : vector<8x128xf32>
    %c57 = arith.constant 57 : index
    %254 = memref.load %arg1[%c57] : memref<384xf32, #tpu.memory_space<smem>>
    %255 = vector.broadcast %254 : f32 to vector<8x128xf32>
    %256 = arith.mulf %19, %255 : vector<8x128xf32>
    %257 = arith.addf %253, %256 : vector<8x128xf32>
    %c58 = arith.constant 58 : index
    %258 = memref.load %arg1[%c58] : memref<384xf32, #tpu.memory_space<smem>>
    %259 = vector.broadcast %258 : f32 to vector<8x128xf32>
    %260 = arith.mulf %21, %259 : vector<8x128xf32>
    %261 = arith.addf %257, %260 : vector<8x128xf32>
    %c59 = arith.constant 59 : index
    %262 = memref.load %arg1[%c59] : memref<384xf32, #tpu.memory_space<smem>>
    %263 = vector.broadcast %262 : f32 to vector<8x128xf32>
    %264 = arith.mulf %23, %263 : vector<8x128xf32>
    %265 = arith.addf %261, %264 : vector<8x128xf32>
    %c60 = arith.constant 60 : index
    %266 = memref.load %arg1[%c60] : memref<384xf32, #tpu.memory_space<smem>>
    %267 = vector.broadcast %266 : f32 to vector<8x128xf32>
    %268 = arith.mulf %25, %267 : vector<8x128xf32>
    %269 = arith.addf %265, %268 : vector<8x128xf32>
    %c61 = arith.constant 61 : index
    %270 = memref.load %arg1[%c61] : memref<384xf32, #tpu.memory_space<smem>>
    %271 = vector.broadcast %270 : f32 to vector<8x128xf32>
    %272 = arith.mulf %27, %271 : vector<8x128xf32>
    %273 = arith.addf %269, %272 : vector<8x128xf32>
    %c62 = arith.constant 62 : index
    %274 = memref.load %arg1[%c62] : memref<384xf32, #tpu.memory_space<smem>>
    %275 = vector.broadcast %274 : f32 to vector<8x128xf32>
    %276 = arith.mulf %29, %275 : vector<8x128xf32>
    %277 = arith.addf %273, %276 : vector<8x128xf32>
    %c64 = arith.constant 64 : index
    %278 = memref.load %arg1[%c64] : memref<384xf32, #tpu.memory_space<smem>>
    %279 = vector.broadcast %278 : f32 to vector<8x128xf32>
    %280 = arith.mulf %1, %279 : vector<8x128xf32>
    %c79 = arith.constant 79 : index
    %281 = memref.load %arg1[%c79] : memref<384xf32, #tpu.memory_space<smem>>
    %282 = vector.broadcast %281 : f32 to vector<8x128xf32>
    %283 = arith.addf %280, %282 : vector<8x128xf32>
    %c65 = arith.constant 65 : index
    %284 = memref.load %arg1[%c65] : memref<384xf32, #tpu.memory_space<smem>>
    %285 = vector.broadcast %284 : f32 to vector<8x128xf32>
    %286 = arith.mulf %3, %285 : vector<8x128xf32>
    %287 = arith.addf %283, %286 : vector<8x128xf32>
    %c66 = arith.constant 66 : index
    %288 = memref.load %arg1[%c66] : memref<384xf32, #tpu.memory_space<smem>>
    %289 = vector.broadcast %288 : f32 to vector<8x128xf32>
    %290 = arith.mulf %5, %289 : vector<8x128xf32>
    %291 = arith.addf %287, %290 : vector<8x128xf32>
    %c67 = arith.constant 67 : index
    %292 = memref.load %arg1[%c67] : memref<384xf32, #tpu.memory_space<smem>>
    %293 = vector.broadcast %292 : f32 to vector<8x128xf32>
    %294 = arith.mulf %7, %293 : vector<8x128xf32>
    %295 = arith.addf %291, %294 : vector<8x128xf32>
    %c68 = arith.constant 68 : index
    %296 = memref.load %arg1[%c68] : memref<384xf32, #tpu.memory_space<smem>>
    %297 = vector.broadcast %296 : f32 to vector<8x128xf32>
    %298 = arith.mulf %9, %297 : vector<8x128xf32>
    %299 = arith.addf %295, %298 : vector<8x128xf32>
    %c69 = arith.constant 69 : index
    %300 = memref.load %arg1[%c69] : memref<384xf32, #tpu.memory_space<smem>>
    %301 = vector.broadcast %300 : f32 to vector<8x128xf32>
    %302 = arith.mulf %11, %301 : vector<8x128xf32>
    %303 = arith.addf %299, %302 : vector<8x128xf32>
    %c70 = arith.constant 70 : index
    %304 = memref.load %arg1[%c70] : memref<384xf32, #tpu.memory_space<smem>>
    %305 = vector.broadcast %304 : f32 to vector<8x128xf32>
    %306 = arith.mulf %13, %305 : vector<8x128xf32>
    %307 = arith.addf %303, %306 : vector<8x128xf32>
    %c71 = arith.constant 71 : index
    %308 = memref.load %arg1[%c71] : memref<384xf32, #tpu.memory_space<smem>>
    %309 = vector.broadcast %308 : f32 to vector<8x128xf32>
    %310 = arith.mulf %15, %309 : vector<8x128xf32>
    %311 = arith.addf %307, %310 : vector<8x128xf32>
    %c72 = arith.constant 72 : index
    %312 = memref.load %arg1[%c72] : memref<384xf32, #tpu.memory_space<smem>>
    %313 = vector.broadcast %312 : f32 to vector<8x128xf32>
    %314 = arith.mulf %17, %313 : vector<8x128xf32>
    %315 = arith.addf %311, %314 : vector<8x128xf32>
    %c73 = arith.constant 73 : index
    %316 = memref.load %arg1[%c73] : memref<384xf32, #tpu.memory_space<smem>>
    %317 = vector.broadcast %316 : f32 to vector<8x128xf32>
    %318 = arith.mulf %19, %317 : vector<8x128xf32>
    %319 = arith.addf %315, %318 : vector<8x128xf32>
    %c74 = arith.constant 74 : index
    %320 = memref.load %arg1[%c74] : memref<384xf32, #tpu.memory_space<smem>>
    %321 = vector.broadcast %320 : f32 to vector<8x128xf32>
    %322 = arith.mulf %21, %321 : vector<8x128xf32>
    %323 = arith.addf %319, %322 : vector<8x128xf32>
    %c75 = arith.constant 75 : index
    %324 = memref.load %arg1[%c75] : memref<384xf32, #tpu.memory_space<smem>>
    %325 = vector.broadcast %324 : f32 to vector<8x128xf32>
    %326 = arith.mulf %23, %325 : vector<8x128xf32>
    %327 = arith.addf %323, %326 : vector<8x128xf32>
    %c76 = arith.constant 76 : index
    %328 = memref.load %arg1[%c76] : memref<384xf32, #tpu.memory_space<smem>>
    %329 = vector.broadcast %328 : f32 to vector<8x128xf32>
    %330 = arith.mulf %25, %329 : vector<8x128xf32>
    %331 = arith.addf %327, %330 : vector<8x128xf32>
    %c77 = arith.constant 77 : index
    %332 = memref.load %arg1[%c77] : memref<384xf32, #tpu.memory_space<smem>>
    %333 = vector.broadcast %332 : f32 to vector<8x128xf32>
    %334 = arith.mulf %27, %333 : vector<8x128xf32>
    %335 = arith.addf %331, %334 : vector<8x128xf32>
    %c78 = arith.constant 78 : index
    %336 = memref.load %arg1[%c78] : memref<384xf32, #tpu.memory_space<smem>>
    %337 = vector.broadcast %336 : f32 to vector<8x128xf32>
    %338 = arith.mulf %29, %337 : vector<8x128xf32>
    %339 = arith.addf %335, %338 : vector<8x128xf32>
    %c80 = arith.constant 80 : index
    %340 = memref.load %arg1[%c80] : memref<384xf32, #tpu.memory_space<smem>>
    %341 = vector.broadcast %340 : f32 to vector<8x128xf32>
    %342 = arith.mulf %1, %341 : vector<8x128xf32>
    %c95 = arith.constant 95 : index
    %343 = memref.load %arg1[%c95] : memref<384xf32, #tpu.memory_space<smem>>
    %344 = vector.broadcast %343 : f32 to vector<8x128xf32>
    %345 = arith.addf %342, %344 : vector<8x128xf32>
    %c81 = arith.constant 81 : index
    %346 = memref.load %arg1[%c81] : memref<384xf32, #tpu.memory_space<smem>>
    %347 = vector.broadcast %346 : f32 to vector<8x128xf32>
    %348 = arith.mulf %3, %347 : vector<8x128xf32>
    %349 = arith.addf %345, %348 : vector<8x128xf32>
    %c82 = arith.constant 82 : index
    %350 = memref.load %arg1[%c82] : memref<384xf32, #tpu.memory_space<smem>>
    %351 = vector.broadcast %350 : f32 to vector<8x128xf32>
    %352 = arith.mulf %5, %351 : vector<8x128xf32>
    %353 = arith.addf %349, %352 : vector<8x128xf32>
    %c83 = arith.constant 83 : index
    %354 = memref.load %arg1[%c83] : memref<384xf32, #tpu.memory_space<smem>>
    %355 = vector.broadcast %354 : f32 to vector<8x128xf32>
    %356 = arith.mulf %7, %355 : vector<8x128xf32>
    %357 = arith.addf %353, %356 : vector<8x128xf32>
    %c84 = arith.constant 84 : index
    %358 = memref.load %arg1[%c84] : memref<384xf32, #tpu.memory_space<smem>>
    %359 = vector.broadcast %358 : f32 to vector<8x128xf32>
    %360 = arith.mulf %9, %359 : vector<8x128xf32>
    %361 = arith.addf %357, %360 : vector<8x128xf32>
    %c85 = arith.constant 85 : index
    %362 = memref.load %arg1[%c85] : memref<384xf32, #tpu.memory_space<smem>>
    %363 = vector.broadcast %362 : f32 to vector<8x128xf32>
    %364 = arith.mulf %11, %363 : vector<8x128xf32>
    %365 = arith.addf %361, %364 : vector<8x128xf32>
    %c86 = arith.constant 86 : index
    %366 = memref.load %arg1[%c86] : memref<384xf32, #tpu.memory_space<smem>>
    %367 = vector.broadcast %366 : f32 to vector<8x128xf32>
    %368 = arith.mulf %13, %367 : vector<8x128xf32>
    %369 = arith.addf %365, %368 : vector<8x128xf32>
    %c87 = arith.constant 87 : index
    %370 = memref.load %arg1[%c87] : memref<384xf32, #tpu.memory_space<smem>>
    %371 = vector.broadcast %370 : f32 to vector<8x128xf32>
    %372 = arith.mulf %15, %371 : vector<8x128xf32>
    %373 = arith.addf %369, %372 : vector<8x128xf32>
    %c88 = arith.constant 88 : index
    %374 = memref.load %arg1[%c88] : memref<384xf32, #tpu.memory_space<smem>>
    %375 = vector.broadcast %374 : f32 to vector<8x128xf32>
    %376 = arith.mulf %17, %375 : vector<8x128xf32>
    %377 = arith.addf %373, %376 : vector<8x128xf32>
    %c89 = arith.constant 89 : index
    %378 = memref.load %arg1[%c89] : memref<384xf32, #tpu.memory_space<smem>>
    %379 = vector.broadcast %378 : f32 to vector<8x128xf32>
    %380 = arith.mulf %19, %379 : vector<8x128xf32>
    %381 = arith.addf %377, %380 : vector<8x128xf32>
    %c90 = arith.constant 90 : index
    %382 = memref.load %arg1[%c90] : memref<384xf32, #tpu.memory_space<smem>>
    %383 = vector.broadcast %382 : f32 to vector<8x128xf32>
    %384 = arith.mulf %21, %383 : vector<8x128xf32>
    %385 = arith.addf %381, %384 : vector<8x128xf32>
    %c91 = arith.constant 91 : index
    %386 = memref.load %arg1[%c91] : memref<384xf32, #tpu.memory_space<smem>>
    %387 = vector.broadcast %386 : f32 to vector<8x128xf32>
    %388 = arith.mulf %23, %387 : vector<8x128xf32>
    %389 = arith.addf %385, %388 : vector<8x128xf32>
    %c92 = arith.constant 92 : index
    %390 = memref.load %arg1[%c92] : memref<384xf32, #tpu.memory_space<smem>>
    %391 = vector.broadcast %390 : f32 to vector<8x128xf32>
    %392 = arith.mulf %25, %391 : vector<8x128xf32>
    %393 = arith.addf %389, %392 : vector<8x128xf32>
    %c93 = arith.constant 93 : index
    %394 = memref.load %arg1[%c93] : memref<384xf32, #tpu.memory_space<smem>>
    %395 = vector.broadcast %394 : f32 to vector<8x128xf32>
    %396 = arith.mulf %27, %395 : vector<8x128xf32>
    %397 = arith.addf %393, %396 : vector<8x128xf32>
    %c94 = arith.constant 94 : index
    %398 = memref.load %arg1[%c94] : memref<384xf32, #tpu.memory_space<smem>>
    %399 = vector.broadcast %398 : f32 to vector<8x128xf32>
    %400 = arith.mulf %29, %399 : vector<8x128xf32>
    %401 = arith.addf %397, %400 : vector<8x128xf32>
    %c96 = arith.constant 96 : index
    %402 = memref.load %arg1[%c96] : memref<384xf32, #tpu.memory_space<smem>>
    %403 = vector.broadcast %402 : f32 to vector<8x128xf32>
    %404 = arith.mulf %1, %403 : vector<8x128xf32>
    %c111 = arith.constant 111 : index
    %405 = memref.load %arg1[%c111] : memref<384xf32, #tpu.memory_space<smem>>
    %406 = vector.broadcast %405 : f32 to vector<8x128xf32>
    %407 = arith.addf %404, %406 : vector<8x128xf32>
    %c97 = arith.constant 97 : index
    %408 = memref.load %arg1[%c97] : memref<384xf32, #tpu.memory_space<smem>>
    %409 = vector.broadcast %408 : f32 to vector<8x128xf32>
    %410 = arith.mulf %3, %409 : vector<8x128xf32>
    %411 = arith.addf %407, %410 : vector<8x128xf32>
    %c98 = arith.constant 98 : index
    %412 = memref.load %arg1[%c98] : memref<384xf32, #tpu.memory_space<smem>>
    %413 = vector.broadcast %412 : f32 to vector<8x128xf32>
    %414 = arith.mulf %5, %413 : vector<8x128xf32>
    %415 = arith.addf %411, %414 : vector<8x128xf32>
    %c99 = arith.constant 99 : index
    %416 = memref.load %arg1[%c99] : memref<384xf32, #tpu.memory_space<smem>>
    %417 = vector.broadcast %416 : f32 to vector<8x128xf32>
    %418 = arith.mulf %7, %417 : vector<8x128xf32>
    %419 = arith.addf %415, %418 : vector<8x128xf32>
    %c100 = arith.constant 100 : index
    %420 = memref.load %arg1[%c100] : memref<384xf32, #tpu.memory_space<smem>>
    %421 = vector.broadcast %420 : f32 to vector<8x128xf32>
    %422 = arith.mulf %9, %421 : vector<8x128xf32>
    %423 = arith.addf %419, %422 : vector<8x128xf32>
    %c101 = arith.constant 101 : index
    %424 = memref.load %arg1[%c101] : memref<384xf32, #tpu.memory_space<smem>>
    %425 = vector.broadcast %424 : f32 to vector<8x128xf32>
    %426 = arith.mulf %11, %425 : vector<8x128xf32>
    %427 = arith.addf %423, %426 : vector<8x128xf32>
    %c102 = arith.constant 102 : index
    %428 = memref.load %arg1[%c102] : memref<384xf32, #tpu.memory_space<smem>>
    %429 = vector.broadcast %428 : f32 to vector<8x128xf32>
    %430 = arith.mulf %13, %429 : vector<8x128xf32>
    %431 = arith.addf %427, %430 : vector<8x128xf32>
    %c103 = arith.constant 103 : index
    %432 = memref.load %arg1[%c103] : memref<384xf32, #tpu.memory_space<smem>>
    %433 = vector.broadcast %432 : f32 to vector<8x128xf32>
    %434 = arith.mulf %15, %433 : vector<8x128xf32>
    %435 = arith.addf %431, %434 : vector<8x128xf32>
    %c104 = arith.constant 104 : index
    %436 = memref.load %arg1[%c104] : memref<384xf32, #tpu.memory_space<smem>>
    %437 = vector.broadcast %436 : f32 to vector<8x128xf32>
    %438 = arith.mulf %17, %437 : vector<8x128xf32>
    %439 = arith.addf %435, %438 : vector<8x128xf32>
    %c105 = arith.constant 105 : index
    %440 = memref.load %arg1[%c105] : memref<384xf32, #tpu.memory_space<smem>>
    %441 = vector.broadcast %440 : f32 to vector<8x128xf32>
    %442 = arith.mulf %19, %441 : vector<8x128xf32>
    %443 = arith.addf %439, %442 : vector<8x128xf32>
    %c106 = arith.constant 106 : index
    %444 = memref.load %arg1[%c106] : memref<384xf32, #tpu.memory_space<smem>>
    %445 = vector.broadcast %444 : f32 to vector<8x128xf32>
    %446 = arith.mulf %21, %445 : vector<8x128xf32>
    %447 = arith.addf %443, %446 : vector<8x128xf32>
    %c107 = arith.constant 107 : index
    %448 = memref.load %arg1[%c107] : memref<384xf32, #tpu.memory_space<smem>>
    %449 = vector.broadcast %448 : f32 to vector<8x128xf32>
    %450 = arith.mulf %23, %449 : vector<8x128xf32>
    %451 = arith.addf %447, %450 : vector<8x128xf32>
    %c108 = arith.constant 108 : index
    %452 = memref.load %arg1[%c108] : memref<384xf32, #tpu.memory_space<smem>>
    %453 = vector.broadcast %452 : f32 to vector<8x128xf32>
    %454 = arith.mulf %25, %453 : vector<8x128xf32>
    %455 = arith.addf %451, %454 : vector<8x128xf32>
    %c109 = arith.constant 109 : index
    %456 = memref.load %arg1[%c109] : memref<384xf32, #tpu.memory_space<smem>>
    %457 = vector.broadcast %456 : f32 to vector<8x128xf32>
    %458 = arith.mulf %27, %457 : vector<8x128xf32>
    %459 = arith.addf %455, %458 : vector<8x128xf32>
    %c110 = arith.constant 110 : index
    %460 = memref.load %arg1[%c110] : memref<384xf32, #tpu.memory_space<smem>>
    %461 = vector.broadcast %460 : f32 to vector<8x128xf32>
    %462 = arith.mulf %29, %461 : vector<8x128xf32>
    %463 = arith.addf %459, %462 : vector<8x128xf32>
    %c112 = arith.constant 112 : index
    %464 = memref.load %arg1[%c112] : memref<384xf32, #tpu.memory_space<smem>>
    %465 = vector.broadcast %464 : f32 to vector<8x128xf32>
    %466 = arith.mulf %1, %465 : vector<8x128xf32>
    %c127 = arith.constant 127 : index
    %467 = memref.load %arg1[%c127] : memref<384xf32, #tpu.memory_space<smem>>
    %468 = vector.broadcast %467 : f32 to vector<8x128xf32>
    %469 = arith.addf %466, %468 : vector<8x128xf32>
    %c113 = arith.constant 113 : index
    %470 = memref.load %arg1[%c113] : memref<384xf32, #tpu.memory_space<smem>>
    %471 = vector.broadcast %470 : f32 to vector<8x128xf32>
    %472 = arith.mulf %3, %471 : vector<8x128xf32>
    %473 = arith.addf %469, %472 : vector<8x128xf32>
    %c114 = arith.constant 114 : index
    %474 = memref.load %arg1[%c114] : memref<384xf32, #tpu.memory_space<smem>>
    %475 = vector.broadcast %474 : f32 to vector<8x128xf32>
    %476 = arith.mulf %5, %475 : vector<8x128xf32>
    %477 = arith.addf %473, %476 : vector<8x128xf32>
    %c115 = arith.constant 115 : index
    %478 = memref.load %arg1[%c115] : memref<384xf32, #tpu.memory_space<smem>>
    %479 = vector.broadcast %478 : f32 to vector<8x128xf32>
    %480 = arith.mulf %7, %479 : vector<8x128xf32>
    %481 = arith.addf %477, %480 : vector<8x128xf32>
    %c116 = arith.constant 116 : index
    %482 = memref.load %arg1[%c116] : memref<384xf32, #tpu.memory_space<smem>>
    %483 = vector.broadcast %482 : f32 to vector<8x128xf32>
    %484 = arith.mulf %9, %483 : vector<8x128xf32>
    %485 = arith.addf %481, %484 : vector<8x128xf32>
    %c117 = arith.constant 117 : index
    %486 = memref.load %arg1[%c117] : memref<384xf32, #tpu.memory_space<smem>>
    %487 = vector.broadcast %486 : f32 to vector<8x128xf32>
    %488 = arith.mulf %11, %487 : vector<8x128xf32>
    %489 = arith.addf %485, %488 : vector<8x128xf32>
    %c118 = arith.constant 118 : index
    %490 = memref.load %arg1[%c118] : memref<384xf32, #tpu.memory_space<smem>>
    %491 = vector.broadcast %490 : f32 to vector<8x128xf32>
    %492 = arith.mulf %13, %491 : vector<8x128xf32>
    %493 = arith.addf %489, %492 : vector<8x128xf32>
    %c119 = arith.constant 119 : index
    %494 = memref.load %arg1[%c119] : memref<384xf32, #tpu.memory_space<smem>>
    %495 = vector.broadcast %494 : f32 to vector<8x128xf32>
    %496 = arith.mulf %15, %495 : vector<8x128xf32>
    %497 = arith.addf %493, %496 : vector<8x128xf32>
    %c120 = arith.constant 120 : index
    %498 = memref.load %arg1[%c120] : memref<384xf32, #tpu.memory_space<smem>>
    %499 = vector.broadcast %498 : f32 to vector<8x128xf32>
    %500 = arith.mulf %17, %499 : vector<8x128xf32>
    %501 = arith.addf %497, %500 : vector<8x128xf32>
    %c121 = arith.constant 121 : index
    %502 = memref.load %arg1[%c121] : memref<384xf32, #tpu.memory_space<smem>>
    %503 = vector.broadcast %502 : f32 to vector<8x128xf32>
    %504 = arith.mulf %19, %503 : vector<8x128xf32>
    %505 = arith.addf %501, %504 : vector<8x128xf32>
    %c122 = arith.constant 122 : index
    %506 = memref.load %arg1[%c122] : memref<384xf32, #tpu.memory_space<smem>>
    %507 = vector.broadcast %506 : f32 to vector<8x128xf32>
    %508 = arith.mulf %21, %507 : vector<8x128xf32>
    %509 = arith.addf %505, %508 : vector<8x128xf32>
    %c123 = arith.constant 123 : index
    %510 = memref.load %arg1[%c123] : memref<384xf32, #tpu.memory_space<smem>>
    %511 = vector.broadcast %510 : f32 to vector<8x128xf32>
    %512 = arith.mulf %23, %511 : vector<8x128xf32>
    %513 = arith.addf %509, %512 : vector<8x128xf32>
    %c124 = arith.constant 124 : index
    %514 = memref.load %arg1[%c124] : memref<384xf32, #tpu.memory_space<smem>>
    %515 = vector.broadcast %514 : f32 to vector<8x128xf32>
    %516 = arith.mulf %25, %515 : vector<8x128xf32>
    %517 = arith.addf %513, %516 : vector<8x128xf32>
    %c125 = arith.constant 125 : index
    %518 = memref.load %arg1[%c125] : memref<384xf32, #tpu.memory_space<smem>>
    %519 = vector.broadcast %518 : f32 to vector<8x128xf32>
    %520 = arith.mulf %27, %519 : vector<8x128xf32>
    %521 = arith.addf %517, %520 : vector<8x128xf32>
    %c126 = arith.constant 126 : index
    %522 = memref.load %arg1[%c126] : memref<384xf32, #tpu.memory_space<smem>>
    %523 = vector.broadcast %522 : f32 to vector<8x128xf32>
    %524 = arith.mulf %29, %523 : vector<8x128xf32>
    %525 = arith.addf %521, %524 : vector<8x128xf32>
    %cst = arith.constant 0.000000e+00 : f32
    %526 = vector.broadcast %cst : f32 to vector<8x128xf32>
    %527 = arith.subf %526, %91 : vector<8x128xf32>
    %528 = math.exp %527 : vector<8x128xf32>
    %cst_45 = arith.constant 1.000000e+00 : f32
    %529 = vector.broadcast %cst_45 : f32 to vector<8x128xf32>
    %530 = arith.addf %529, %528 : vector<8x128xf32>
    %531 = tpu.reciprocal %530 {approx = true} : vector<8x128xf32> -> vector<8x128xf32>
    %cst_46 = arith.constant 0.000000e+00 : f32
    %532 = vector.broadcast %cst_46 : f32 to vector<8x128xf32>
    %533 = arith.subf %532, %153 : vector<8x128xf32>
    %534 = math.exp %533 : vector<8x128xf32>
    %cst_47 = arith.constant 1.000000e+00 : f32
    %535 = vector.broadcast %cst_47 : f32 to vector<8x128xf32>
    %536 = arith.addf %535, %534 : vector<8x128xf32>
    %537 = tpu.reciprocal %536 {approx = true} : vector<8x128xf32> -> vector<8x128xf32>
    %cst_48 = arith.constant 0.000000e+00 : f32
    %538 = vector.broadcast %cst_48 : f32 to vector<8x128xf32>
    %539 = arith.subf %538, %215 : vector<8x128xf32>
    %540 = math.exp %539 : vector<8x128xf32>
    %cst_49 = arith.constant 1.000000e+00 : f32
    %541 = vector.broadcast %cst_49 : f32 to vector<8x128xf32>
    %542 = arith.addf %541, %540 : vector<8x128xf32>
    %543 = tpu.reciprocal %542 {approx = true} : vector<8x128xf32> -> vector<8x128xf32>
    %cst_50 = arith.constant 0.000000e+00 : f32
    %544 = vector.broadcast %cst_50 : f32 to vector<8x128xf32>
    %545 = arith.subf %544, %277 : vector<8x128xf32>
    %546 = math.exp %545 : vector<8x128xf32>
    %cst_51 = arith.constant 1.000000e+00 : f32
    %547 = vector.broadcast %cst_51 : f32 to vector<8x128xf32>
    %548 = arith.addf %547, %546 : vector<8x128xf32>
    %549 = tpu.reciprocal %548 {approx = true} : vector<8x128xf32> -> vector<8x128xf32>
    %cst_52 = arith.constant 0.000000e+00 : f32
    %550 = vector.broadcast %cst_52 : f32 to vector<8x128xf32>
    %551 = arith.subf %550, %339 : vector<8x128xf32>
    %552 = math.exp %551 : vector<8x128xf32>
    %cst_53 = arith.constant 1.000000e+00 : f32
    %553 = vector.broadcast %cst_53 : f32 to vector<8x128xf32>
    %554 = arith.addf %553, %552 : vector<8x128xf32>
    %555 = tpu.reciprocal %554 {approx = true} : vector<8x128xf32> -> vector<8x128xf32>
    %cst_54 = arith.constant 0.000000e+00 : f32
    %556 = vector.broadcast %cst_54 : f32 to vector<8x128xf32>
    %557 = arith.subf %556, %401 : vector<8x128xf32>
    %558 = math.exp %557 : vector<8x128xf32>
    %cst_55 = arith.constant 1.000000e+00 : f32
    %559 = vector.broadcast %cst_55 : f32 to vector<8x128xf32>
    %560 = arith.addf %559, %558 : vector<8x128xf32>
    %561 = tpu.reciprocal %560 {approx = true} : vector<8x128xf32> -> vector<8x128xf32>
    %cst_56 = arith.constant 0.000000e+00 : f32
    %562 = vector.broadcast %cst_56 : f32 to vector<8x128xf32>
    %563 = arith.subf %562, %463 : vector<8x128xf32>
    %564 = math.exp %563 : vector<8x128xf32>
    %cst_57 = arith.constant 1.000000e+00 : f32
    %565 = vector.broadcast %cst_57 : f32 to vector<8x128xf32>
    %566 = arith.addf %565, %564 : vector<8x128xf32>
    %567 = tpu.reciprocal %566 {approx = true} : vector<8x128xf32> -> vector<8x128xf32>
    %cst_58 = arith.constant 0.000000e+00 : f32
    %568 = vector.broadcast %cst_58 : f32 to vector<8x128xf32>
    %569 = arith.subf %568, %525 : vector<8x128xf32>
    %570 = math.exp %569 : vector<8x128xf32>
    %cst_59 = arith.constant 1.000000e+00 : f32
    %571 = vector.broadcast %cst_59 : f32 to vector<8x128xf32>
    %572 = arith.addf %571, %570 : vector<8x128xf32>
    %573 = tpu.reciprocal %572 {approx = true} : vector<8x128xf32> -> vector<8x128xf32>
    %c128 = arith.constant 128 : index
    %574 = memref.load %arg1[%c128] : memref<384xf32, #tpu.memory_space<smem>>
    %575 = vector.broadcast %574 : f32 to vector<8x128xf32>
    %576 = arith.mulf %531, %575 : vector<8x128xf32>
    %c143 = arith.constant 143 : index
    %577 = memref.load %arg1[%c143] : memref<384xf32, #tpu.memory_space<smem>>
    %578 = vector.broadcast %577 : f32 to vector<8x128xf32>
    %579 = arith.addf %576, %578 : vector<8x128xf32>
    %c129 = arith.constant 129 : index
    %580 = memref.load %arg1[%c129] : memref<384xf32, #tpu.memory_space<smem>>
    %581 = vector.broadcast %580 : f32 to vector<8x128xf32>
    %582 = arith.mulf %537, %581 : vector<8x128xf32>
    %583 = arith.addf %579, %582 : vector<8x128xf32>
    %c130 = arith.constant 130 : index
    %584 = memref.load %arg1[%c130] : memref<384xf32, #tpu.memory_space<smem>>
    %585 = vector.broadcast %584 : f32 to vector<8x128xf32>
    %586 = arith.mulf %543, %585 : vector<8x128xf32>
    %587 = arith.addf %583, %586 : vector<8x128xf32>
    %c131 = arith.constant 131 : index
    %588 = memref.load %arg1[%c131] : memref<384xf32, #tpu.memory_space<smem>>
    %589 = vector.broadcast %588 : f32 to vector<8x128xf32>
    %590 = arith.mulf %549, %589 : vector<8x128xf32>
    %591 = arith.addf %587, %590 : vector<8x128xf32>
    %c132 = arith.constant 132 : index
    %592 = memref.load %arg1[%c132] : memref<384xf32, #tpu.memory_space<smem>>
    %593 = vector.broadcast %592 : f32 to vector<8x128xf32>
    %594 = arith.mulf %555, %593 : vector<8x128xf32>
    %595 = arith.addf %591, %594 : vector<8x128xf32>
    %c133 = arith.constant 133 : index
    %596 = memref.load %arg1[%c133] : memref<384xf32, #tpu.memory_space<smem>>
    %597 = vector.broadcast %596 : f32 to vector<8x128xf32>
    %598 = arith.mulf %561, %597 : vector<8x128xf32>
    %599 = arith.addf %595, %598 : vector<8x128xf32>
    %c134 = arith.constant 134 : index
    %600 = memref.load %arg1[%c134] : memref<384xf32, #tpu.memory_space<smem>>
    %601 = vector.broadcast %600 : f32 to vector<8x128xf32>
    %602 = arith.mulf %567, %601 : vector<8x128xf32>
    %603 = arith.addf %599, %602 : vector<8x128xf32>
    %c135 = arith.constant 135 : index
    %604 = memref.load %arg1[%c135] : memref<384xf32, #tpu.memory_space<smem>>
    %605 = vector.broadcast %604 : f32 to vector<8x128xf32>
    %606 = arith.mulf %573, %605 : vector<8x128xf32>
    %607 = arith.addf %603, %606 : vector<8x128xf32>
    %c144 = arith.constant 144 : index
    %608 = memref.load %arg1[%c144] : memref<384xf32, #tpu.memory_space<smem>>
    %609 = vector.broadcast %608 : f32 to vector<8x128xf32>
    %610 = arith.mulf %531, %609 : vector<8x128xf32>
    %c159 = arith.constant 159 : index
    %611 = memref.load %arg1[%c159] : memref<384xf32, #tpu.memory_space<smem>>
    %612 = vector.broadcast %611 : f32 to vector<8x128xf32>
    %613 = arith.addf %610, %612 : vector<8x128xf32>
    %c145 = arith.constant 145 : index
    %614 = memref.load %arg1[%c145] : memref<384xf32, #tpu.memory_space<smem>>
    %615 = vector.broadcast %614 : f32 to vector<8x128xf32>
    %616 = arith.mulf %537, %615 : vector<8x128xf32>
    %617 = arith.addf %613, %616 : vector<8x128xf32>
    %c146 = arith.constant 146 : index
    %618 = memref.load %arg1[%c146] : memref<384xf32, #tpu.memory_space<smem>>
    %619 = vector.broadcast %618 : f32 to vector<8x128xf32>
    %620 = arith.mulf %543, %619 : vector<8x128xf32>
    %621 = arith.addf %617, %620 : vector<8x128xf32>
    %c147 = arith.constant 147 : index
    %622 = memref.load %arg1[%c147] : memref<384xf32, #tpu.memory_space<smem>>
    %623 = vector.broadcast %622 : f32 to vector<8x128xf32>
    %624 = arith.mulf %549, %623 : vector<8x128xf32>
    %625 = arith.addf %621, %624 : vector<8x128xf32>
    %c148 = arith.constant 148 : index
    %626 = memref.load %arg1[%c148] : memref<384xf32, #tpu.memory_space<smem>>
    %627 = vector.broadcast %626 : f32 to vector<8x128xf32>
    %628 = arith.mulf %555, %627 : vector<8x128xf32>
    %629 = arith.addf %625, %628 : vector<8x128xf32>
    %c149 = arith.constant 149 : index
    %630 = memref.load %arg1[%c149] : memref<384xf32, #tpu.memory_space<smem>>
    %631 = vector.broadcast %630 : f32 to vector<8x128xf32>
    %632 = arith.mulf %561, %631 : vector<8x128xf32>
    %633 = arith.addf %629, %632 : vector<8x128xf32>
    %c150 = arith.constant 150 : index
    %634 = memref.load %arg1[%c150] : memref<384xf32, #tpu.memory_space<smem>>
    %635 = vector.broadcast %634 : f32 to vector<8x128xf32>
    %636 = arith.mulf %567, %635 : vector<8x128xf32>
    %637 = arith.addf %633, %636 : vector<8x128xf32>
    %c151 = arith.constant 151 : index
    %638 = memref.load %arg1[%c151] : memref<384xf32, #tpu.memory_space<smem>>
    %639 = vector.broadcast %638 : f32 to vector<8x128xf32>
    %640 = arith.mulf %573, %639 : vector<8x128xf32>
    %641 = arith.addf %637, %640 : vector<8x128xf32>
    %c160 = arith.constant 160 : index
    %642 = memref.load %arg1[%c160] : memref<384xf32, #tpu.memory_space<smem>>
    %643 = vector.broadcast %642 : f32 to vector<8x128xf32>
    %644 = arith.mulf %531, %643 : vector<8x128xf32>
    %c175 = arith.constant 175 : index
    %645 = memref.load %arg1[%c175] : memref<384xf32, #tpu.memory_space<smem>>
    %646 = vector.broadcast %645 : f32 to vector<8x128xf32>
    %647 = arith.addf %644, %646 : vector<8x128xf32>
    %c161 = arith.constant 161 : index
    %648 = memref.load %arg1[%c161] : memref<384xf32, #tpu.memory_space<smem>>
    %649 = vector.broadcast %648 : f32 to vector<8x128xf32>
    %650 = arith.mulf %537, %649 : vector<8x128xf32>
    %651 = arith.addf %647, %650 : vector<8x128xf32>
    %c162 = arith.constant 162 : index
    %652 = memref.load %arg1[%c162] : memref<384xf32, #tpu.memory_space<smem>>
    %653 = vector.broadcast %652 : f32 to vector<8x128xf32>
    %654 = arith.mulf %543, %653 : vector<8x128xf32>
    %655 = arith.addf %651, %654 : vector<8x128xf32>
    %c163 = arith.constant 163 : index
    %656 = memref.load %arg1[%c163] : memref<384xf32, #tpu.memory_space<smem>>
    %657 = vector.broadcast %656 : f32 to vector<8x128xf32>
    %658 = arith.mulf %549, %657 : vector<8x128xf32>
    %659 = arith.addf %655, %658 : vector<8x128xf32>
    %c164 = arith.constant 164 : index
    %660 = memref.load %arg1[%c164] : memref<384xf32, #tpu.memory_space<smem>>
    %661 = vector.broadcast %660 : f32 to vector<8x128xf32>
    %662 = arith.mulf %555, %661 : vector<8x128xf32>
    %663 = arith.addf %659, %662 : vector<8x128xf32>
    %c165 = arith.constant 165 : index
    %664 = memref.load %arg1[%c165] : memref<384xf32, #tpu.memory_space<smem>>
    %665 = vector.broadcast %664 : f32 to vector<8x128xf32>
    %666 = arith.mulf %561, %665 : vector<8x128xf32>
    %667 = arith.addf %663, %666 : vector<8x128xf32>
    %c166 = arith.constant 166 : index
    %668 = memref.load %arg1[%c166] : memref<384xf32, #tpu.memory_space<smem>>
    %669 = vector.broadcast %668 : f32 to vector<8x128xf32>
    %670 = arith.mulf %567, %669 : vector<8x128xf32>
    %671 = arith.addf %667, %670 : vector<8x128xf32>
    %c167 = arith.constant 167 : index
    %672 = memref.load %arg1[%c167] : memref<384xf32, #tpu.memory_space<smem>>
    %673 = vector.broadcast %672 : f32 to vector<8x128xf32>
    %674 = arith.mulf %573, %673 : vector<8x128xf32>
    %675 = arith.addf %671, %674 : vector<8x128xf32>
    %c176 = arith.constant 176 : index
    %676 = memref.load %arg1[%c176] : memref<384xf32, #tpu.memory_space<smem>>
    %677 = vector.broadcast %676 : f32 to vector<8x128xf32>
    %678 = arith.mulf %531, %677 : vector<8x128xf32>
    %c191 = arith.constant 191 : index
    %679 = memref.load %arg1[%c191] : memref<384xf32, #tpu.memory_space<smem>>
    %680 = vector.broadcast %679 : f32 to vector<8x128xf32>
    %681 = arith.addf %678, %680 : vector<8x128xf32>
    %c177 = arith.constant 177 : index
    %682 = memref.load %arg1[%c177] : memref<384xf32, #tpu.memory_space<smem>>
    %683 = vector.broadcast %682 : f32 to vector<8x128xf32>
    %684 = arith.mulf %537, %683 : vector<8x128xf32>
    %685 = arith.addf %681, %684 : vector<8x128xf32>
    %c178 = arith.constant 178 : index
    %686 = memref.load %arg1[%c178] : memref<384xf32, #tpu.memory_space<smem>>
    %687 = vector.broadcast %686 : f32 to vector<8x128xf32>
    %688 = arith.mulf %543, %687 : vector<8x128xf32>
    %689 = arith.addf %685, %688 : vector<8x128xf32>
    %c179 = arith.constant 179 : index
    %690 = memref.load %arg1[%c179] : memref<384xf32, #tpu.memory_space<smem>>
    %691 = vector.broadcast %690 : f32 to vector<8x128xf32>
    %692 = arith.mulf %549, %691 : vector<8x128xf32>
    %693 = arith.addf %689, %692 : vector<8x128xf32>
    %c180 = arith.constant 180 : index
    %694 = memref.load %arg1[%c180] : memref<384xf32, #tpu.memory_space<smem>>
    %695 = vector.broadcast %694 : f32 to vector<8x128xf32>
    %696 = arith.mulf %555, %695 : vector<8x128xf32>
    %697 = arith.addf %693, %696 : vector<8x128xf32>
    %c181 = arith.constant 181 : index
    %698 = memref.load %arg1[%c181] : memref<384xf32, #tpu.memory_space<smem>>
    %699 = vector.broadcast %698 : f32 to vector<8x128xf32>
    %700 = arith.mulf %561, %699 : vector<8x128xf32>
    %701 = arith.addf %697, %700 : vector<8x128xf32>
    %c182 = arith.constant 182 : index
    %702 = memref.load %arg1[%c182] : memref<384xf32, #tpu.memory_space<smem>>
    %703 = vector.broadcast %702 : f32 to vector<8x128xf32>
    %704 = arith.mulf %567, %703 : vector<8x128xf32>
    %705 = arith.addf %701, %704 : vector<8x128xf32>
    %c183 = arith.constant 183 : index
    %706 = memref.load %arg1[%c183] : memref<384xf32, #tpu.memory_space<smem>>
    %707 = vector.broadcast %706 : f32 to vector<8x128xf32>
    %708 = arith.mulf %573, %707 : vector<8x128xf32>
    %709 = arith.addf %705, %708 : vector<8x128xf32>
    %c192 = arith.constant 192 : index
    %710 = memref.load %arg1[%c192] : memref<384xf32, #tpu.memory_space<smem>>
    %711 = vector.broadcast %710 : f32 to vector<8x128xf32>
    %712 = arith.mulf %531, %711 : vector<8x128xf32>
    %c207 = arith.constant 207 : index
    %713 = memref.load %arg1[%c207] : memref<384xf32, #tpu.memory_space<smem>>
    %714 = vector.broadcast %713 : f32 to vector<8x128xf32>
    %715 = arith.addf %712, %714 : vector<8x128xf32>
    %c193 = arith.constant 193 : index
    %716 = memref.load %arg1[%c193] : memref<384xf32, #tpu.memory_space<smem>>
    %717 = vector.broadcast %716 : f32 to vector<8x128xf32>
    %718 = arith.mulf %537, %717 : vector<8x128xf32>
    %719 = arith.addf %715, %718 : vector<8x128xf32>
    %c194 = arith.constant 194 : index
    %720 = memref.load %arg1[%c194] : memref<384xf32, #tpu.memory_space<smem>>
    %721 = vector.broadcast %720 : f32 to vector<8x128xf32>
    %722 = arith.mulf %543, %721 : vector<8x128xf32>
    %723 = arith.addf %719, %722 : vector<8x128xf32>
    %c195 = arith.constant 195 : index
    %724 = memref.load %arg1[%c195] : memref<384xf32, #tpu.memory_space<smem>>
    %725 = vector.broadcast %724 : f32 to vector<8x128xf32>
    %726 = arith.mulf %549, %725 : vector<8x128xf32>
    %727 = arith.addf %723, %726 : vector<8x128xf32>
    %c196 = arith.constant 196 : index
    %728 = memref.load %arg1[%c196] : memref<384xf32, #tpu.memory_space<smem>>
    %729 = vector.broadcast %728 : f32 to vector<8x128xf32>
    %730 = arith.mulf %555, %729 : vector<8x128xf32>
    %731 = arith.addf %727, %730 : vector<8x128xf32>
    %c197 = arith.constant 197 : index
    %732 = memref.load %arg1[%c197] : memref<384xf32, #tpu.memory_space<smem>>
    %733 = vector.broadcast %732 : f32 to vector<8x128xf32>
    %734 = arith.mulf %561, %733 : vector<8x128xf32>
    %735 = arith.addf %731, %734 : vector<8x128xf32>
    %c198 = arith.constant 198 : index
    %736 = memref.load %arg1[%c198] : memref<384xf32, #tpu.memory_space<smem>>
    %737 = vector.broadcast %736 : f32 to vector<8x128xf32>
    %738 = arith.mulf %567, %737 : vector<8x128xf32>
    %739 = arith.addf %735, %738 : vector<8x128xf32>
    %c199 = arith.constant 199 : index
    %740 = memref.load %arg1[%c199] : memref<384xf32, #tpu.memory_space<smem>>
    %741 = vector.broadcast %740 : f32 to vector<8x128xf32>
    %742 = arith.mulf %573, %741 : vector<8x128xf32>
    %743 = arith.addf %739, %742 : vector<8x128xf32>
    %cst_60 = arith.constant 0.000000e+00 : f32
    %744 = vector.broadcast %cst_60 : f32 to vector<8x128xf32>
    %745 = arith.subf %744, %607 : vector<8x128xf32>
    %746 = math.exp %745 : vector<8x128xf32>
    %cst_61 = arith.constant 1.000000e+00 : f32
    %747 = vector.broadcast %cst_61 : f32 to vector<8x128xf32>
    %748 = arith.addf %747, %746 : vector<8x128xf32>
    %749 = tpu.reciprocal %748 {approx = true} : vector<8x128xf32> -> vector<8x128xf32>
    %cst_62 = arith.constant 0.000000e+00 : f32
    %750 = vector.broadcast %cst_62 : f32 to vector<8x128xf32>
    %751 = arith.subf %750, %641 : vector<8x128xf32>
    %752 = math.exp %751 : vector<8x128xf32>
    %cst_63 = arith.constant 1.000000e+00 : f32
    %753 = vector.broadcast %cst_63 : f32 to vector<8x128xf32>
    %754 = arith.addf %753, %752 : vector<8x128xf32>
    %755 = tpu.reciprocal %754 {approx = true} : vector<8x128xf32> -> vector<8x128xf32>
    %cst_64 = arith.constant 0.000000e+00 : f32
    %756 = vector.broadcast %cst_64 : f32 to vector<8x128xf32>
    %757 = arith.subf %756, %675 : vector<8x128xf32>
    %758 = math.exp %757 : vector<8x128xf32>
    %cst_65 = arith.constant 1.000000e+00 : f32
    %759 = vector.broadcast %cst_65 : f32 to vector<8x128xf32>
    %760 = arith.addf %759, %758 : vector<8x128xf32>
    %761 = tpu.reciprocal %760 {approx = true} : vector<8x128xf32> -> vector<8x128xf32>
    %cst_66 = arith.constant 0.000000e+00 : f32
    %762 = vector.broadcast %cst_66 : f32 to vector<8x128xf32>
    %763 = arith.subf %762, %709 : vector<8x128xf32>
    %764 = math.exp %763 : vector<8x128xf32>
    %cst_67 = arith.constant 1.000000e+00 : f32
    %765 = vector.broadcast %cst_67 : f32 to vector<8x128xf32>
    %766 = arith.addf %765, %764 : vector<8x128xf32>
    %767 = tpu.reciprocal %766 {approx = true} : vector<8x128xf32> -> vector<8x128xf32>
    %cst_68 = arith.constant 0.000000e+00 : f32
    %768 = vector.broadcast %cst_68 : f32 to vector<8x128xf32>
    %769 = arith.subf %768, %743 : vector<8x128xf32>
    %770 = math.exp %769 : vector<8x128xf32>
    %cst_69 = arith.constant 1.000000e+00 : f32
    %771 = vector.broadcast %cst_69 : f32 to vector<8x128xf32>
    %772 = arith.addf %771, %770 : vector<8x128xf32>
    %773 = tpu.reciprocal %772 {approx = true} : vector<8x128xf32> -> vector<8x128xf32>
    %c256 = arith.constant 256 : index
    %774 = memref.load %arg1[%c256] : memref<384xf32, #tpu.memory_space<smem>>
    %775 = vector.broadcast %774 : f32 to vector<8x128xf32>
    %776 = arith.mulf %749, %775 : vector<8x128xf32>
    %c271 = arith.constant 271 : index
    %777 = memref.load %arg1[%c271] : memref<384xf32, #tpu.memory_space<smem>>
    %778 = vector.broadcast %777 : f32 to vector<8x128xf32>
    %779 = arith.addf %776, %778 : vector<8x128xf32>
    %c257 = arith.constant 257 : index
    %780 = memref.load %arg1[%c257] : memref<384xf32, #tpu.memory_space<smem>>
    %781 = vector.broadcast %780 : f32 to vector<8x128xf32>
    %782 = arith.mulf %755, %781 : vector<8x128xf32>
    %783 = arith.addf %779, %782 : vector<8x128xf32>
    %c258 = arith.constant 258 : index
    %784 = memref.load %arg1[%c258] : memref<384xf32, #tpu.memory_space<smem>>
    %785 = vector.broadcast %784 : f32 to vector<8x128xf32>
    %786 = arith.mulf %761, %785 : vector<8x128xf32>
    %787 = arith.addf %783, %786 : vector<8x128xf32>
    %c259 = arith.constant 259 : index
    %788 = memref.load %arg1[%c259] : memref<384xf32, #tpu.memory_space<smem>>
    %789 = vector.broadcast %788 : f32 to vector<8x128xf32>
    %790 = arith.mulf %767, %789 : vector<8x128xf32>
    %791 = arith.addf %787, %790 : vector<8x128xf32>
    %c260 = arith.constant 260 : index
    %792 = memref.load %arg1[%c260] : memref<384xf32, #tpu.memory_space<smem>>
    %793 = vector.broadcast %792 : f32 to vector<8x128xf32>
    %794 = arith.mulf %773, %793 : vector<8x128xf32>
    %795 = arith.addf %791, %794 : vector<8x128xf32>
    %c272 = arith.constant 272 : index
    %796 = memref.load %arg1[%c272] : memref<384xf32, #tpu.memory_space<smem>>
    %797 = vector.broadcast %796 : f32 to vector<8x128xf32>
    %798 = arith.mulf %749, %797 : vector<8x128xf32>
    %c287 = arith.constant 287 : index
    %799 = memref.load %arg1[%c287] : memref<384xf32, #tpu.memory_space<smem>>
    %800 = vector.broadcast %799 : f32 to vector<8x128xf32>
    %801 = arith.addf %798, %800 : vector<8x128xf32>
    %c273 = arith.constant 273 : index
    %802 = memref.load %arg1[%c273] : memref<384xf32, #tpu.memory_space<smem>>
    %803 = vector.broadcast %802 : f32 to vector<8x128xf32>
    %804 = arith.mulf %755, %803 : vector<8x128xf32>
    %805 = arith.addf %801, %804 : vector<8x128xf32>
    %c274 = arith.constant 274 : index
    %806 = memref.load %arg1[%c274] : memref<384xf32, #tpu.memory_space<smem>>
    %807 = vector.broadcast %806 : f32 to vector<8x128xf32>
    %808 = arith.mulf %761, %807 : vector<8x128xf32>
    %809 = arith.addf %805, %808 : vector<8x128xf32>
    %c275 = arith.constant 275 : index
    %810 = memref.load %arg1[%c275] : memref<384xf32, #tpu.memory_space<smem>>
    %811 = vector.broadcast %810 : f32 to vector<8x128xf32>
    %812 = arith.mulf %767, %811 : vector<8x128xf32>
    %813 = arith.addf %809, %812 : vector<8x128xf32>
    %c276 = arith.constant 276 : index
    %814 = memref.load %arg1[%c276] : memref<384xf32, #tpu.memory_space<smem>>
    %815 = vector.broadcast %814 : f32 to vector<8x128xf32>
    %816 = arith.mulf %773, %815 : vector<8x128xf32>
    %817 = arith.addf %813, %816 : vector<8x128xf32>
    %c288 = arith.constant 288 : index
    %818 = memref.load %arg1[%c288] : memref<384xf32, #tpu.memory_space<smem>>
    %819 = vector.broadcast %818 : f32 to vector<8x128xf32>
    %820 = arith.mulf %749, %819 : vector<8x128xf32>
    %c303 = arith.constant 303 : index
    %821 = memref.load %arg1[%c303] : memref<384xf32, #tpu.memory_space<smem>>
    %822 = vector.broadcast %821 : f32 to vector<8x128xf32>
    %823 = arith.addf %820, %822 : vector<8x128xf32>
    %c289 = arith.constant 289 : index
    %824 = memref.load %arg1[%c289] : memref<384xf32, #tpu.memory_space<smem>>
    %825 = vector.broadcast %824 : f32 to vector<8x128xf32>
    %826 = arith.mulf %755, %825 : vector<8x128xf32>
    %827 = arith.addf %823, %826 : vector<8x128xf32>
    %c290 = arith.constant 290 : index
    %828 = memref.load %arg1[%c290] : memref<384xf32, #tpu.memory_space<smem>>
    %829 = vector.broadcast %828 : f32 to vector<8x128xf32>
    %830 = arith.mulf %761, %829 : vector<8x128xf32>
    %831 = arith.addf %827, %830 : vector<8x128xf32>
    %c291 = arith.constant 291 : index
    %832 = memref.load %arg1[%c291] : memref<384xf32, #tpu.memory_space<smem>>
    %833 = vector.broadcast %832 : f32 to vector<8x128xf32>
    %834 = arith.mulf %767, %833 : vector<8x128xf32>
    %835 = arith.addf %831, %834 : vector<8x128xf32>
    %c292 = arith.constant 292 : index
    %836 = memref.load %arg1[%c292] : memref<384xf32, #tpu.memory_space<smem>>
    %837 = vector.broadcast %836 : f32 to vector<8x128xf32>
    %838 = arith.mulf %773, %837 : vector<8x128xf32>
    %839 = arith.addf %835, %838 : vector<8x128xf32>
    %c0_70 = arith.constant 0 : index
    %c0_71 = arith.constant 0 : index
    %c0_72 = arith.constant 0 : index
    %840 = vector.load %arg3[%c0_70, %c0_71, %c0_72] : memref<3x8x128xf32, #tpu.memory_space<vmem>>, vector<1x8x128xf32>
    %841 = vector.shape_cast %840 : vector<1x8x128xf32> to vector<8x128xf32>
    %842 = vector.shape_cast %795 : vector<8x128xf32> to vector<1x8x128xf32>
    tpu.vector_store %arg3[%c0_70, %c0_71, %c0_72], %842 {strides = array<i32>} : memref<3x8x128xf32, #tpu.memory_space<vmem>>, vector<1x8x128xf32>,
    %c1_73 = arith.constant 1 : index
    %c0_74 = arith.constant 0 : index
    %c0_75 = arith.constant 0 : index
    %843 = vector.load %arg3[%c1_73, %c0_74, %c0_75] : memref<3x8x128xf32, #tpu.memory_space<vmem>>, vector<1x8x128xf32>
    %844 = vector.shape_cast %843 : vector<1x8x128xf32> to vector<8x128xf32>
    %845 = vector.shape_cast %817 : vector<8x128xf32> to vector<1x8x128xf32>
    tpu.vector_store %arg3[%c1_73, %c0_74, %c0_75], %845 {strides = array<i32>} : memref<3x8x128xf32, #tpu.memory_space<vmem>>, vector<1x8x128xf32>,
    %c2_76 = arith.constant 2 : index
    %c0_77 = arith.constant 0 : index
    %c0_78 = arith.constant 0 : index
    %846 = vector.load %arg3[%c2_76, %c0_77, %c0_78] : memref<3x8x128xf32, #tpu.memory_space<vmem>>, vector<1x8x128xf32>
    %847 = vector.shape_cast %846 : vector<1x8x128xf32> to vector<8x128xf32>
    %848 = vector.shape_cast %839 : vector<8x128xf32> to vector<1x8x128xf32>
    tpu.vector_store %arg3[%c2_76, %c0_77, %c0_78], %848 {strides = array<i32>} : memref<3x8x128xf32, #tpu.memory_space<vmem>>, vector<1x8x128xf32>,
    return
  }
  func.func @transform_0(%arg0: i32) -> i32 {
    %c0_i32 = arith.constant 0 : i32
    %c0_i32_0 = arith.constant 0 : i32
    return %c0_i32 : i32
  }
  func.func @transform_1(%arg0: i32) -> (i32, i32, i32) {
    %c0_i32 = arith.constant 0 : i32
    %c0_i32_0 = arith.constant 0 : i32
    %c0_i32_1 = arith.constant 0 : i32
    return %c0_i32, %arg0, %c0_i32_0 : i32, i32, i32
  }
  func.func @transform_2(%arg0: i32) -> (i32, i32, i32) {
    %c0_i32 = arith.constant 0 : i32
    %c0_i32_0 = arith.constant 0 : i32
    %c0_i32_1 = arith.constant 0 : i32
    return %c0_i32, %arg0, %c0_i32_0 : i32, i32, i32
  }
}

</mosaic_0001>

<bundles_post_ra>
// kernel: tpu_custom_call.1
= control target key start
LH: loop header
LB: loop body
LE: loop exit
PB: predicated region body
PF: predicated region fallthrough
CT: control target
= control target key end

     0   :  { %s2076_s0 = inlined_call_operand.hbm [shape: f32[384], index: 0, kind: input, shape index: {}]   ;;  %s2077_s1 = inlined_call_operand.hbm [shape: f32[15,8,128], index: 1, kind: input, shape index: {}]   ;;  %s2078_s2 = inlined_call_operand.hbm [shape: f32[3,8,128], index: 2, kind: output, shape index: {}]  }
   0x1   :  { %2084 = sst [smem:[#allocation13_spill]] %s2078_s2 }
   0x2   :  { %7 = vsyncpa [#allocation5], 0 }
   0x3   :  { %8 = vsyncpa [#allocation3], 0 }
   0x4   :  { %9 = vsyncpa [#allocation4], 0  ;;  %s1133_s11 = scalar_lea.hbm %s2076_s0, 48  ;;  %s1135_s16 = scalar_lea.hbm %s2076_s0, 64 }
   0x5   :  { %p1134_p0 = scmp.ne.s32.totalorder %s2076_s0, %s1133_s11  ;;  %p1136_p1 = scmp.lt.u32.totalorder %s1135_s16, %s1133_s11 }
   0x6   :  { %p1137_p2 = scmp.lt.u32.totalorder %s1133_s11, %s2076_s0 }
   0x8   :  { %p1138_p3 = por %p1137_p2, %p1136_p1 }
   0xa   :  { %p1139_p4 = pnand %p1138_p3, %p1134_p0 }
   0xc   :  { %1142 = shalt.err (!%p1139_p4)
}
   0xd   :  { %s1193_s19 = smov [#allocation2]   ;;  %s1194_s22 = smov [#allocation6]  }
   0xe   :  { %17 = dma.hbm_to_smem %s2076_s0, 48, %s1193_s19, [#allocation5]  }
   0xf   :  { %s23_s23 = sshll.u32 %s1194_s22, 4  ;;  %s1143_s26 = scalar_lea.hbm %s2077_s1, 1920  ;;  %s24_s23 = int_to_ptr.vmem [resolvable:$true] %s23_s23 }
  0x10   :  { %p1144_p5 = scmp.ne.s32.totalorder %s2077_s1, %s1143_s26  ;;  %p1147_p6 = scmp.lt.u32.totalorder %s1143_s26, %s2077_s1 }
  0x12   :  { %p1149_p7 = pnand %p1147_p6, %p1144_p5 }
  0x14   :  { %1152 = shalt.err (!%p1149_p7)
}
  0x15   :  { %s1153_s3 = scalar_lea.vmem %s24_s23, 1920  ;;  %p1158_p9 = scmp.lt.s32.totalorder %s24_s23, %s24_s23 }
  0x16   :  { %p1154_p8 = scmp.ne.s32.totalorder %s24_s23, %s1153_s3  ;;  %p1159_p10 = scmp.lt.s32.totalorder %s1153_s3, %s1153_s3 }
  0x18   :  { %p1160_p11 = por %p1159_p10, %p1158_p9 }
  0x1a   :  { %p1161_p12 = pnand %p1160_p11, %p1154_p8 }
  0x1c   :  { %1164 = shalt.err (!%p1161_p12)
}
  0x1d   :  { %s2079_s0 = smov 128   ;;  %s2080_s4 = smov 8  }
  0x1e   :  { %29 = dma.hbm_to_vmem [thread:$0]  %s2077_s1, 1920, %s24_s23, [#allocation3], %s2079_s0, %s2079_s0, %s2080_s4  }
  0x1f   :  { %1187 = dma.done.wait [#allocation5], 48  }
  0x20   :  { %1188 = vsyncadd [#allocation5], 4294967248 }
  0x21   :  { %1189 = dma.done.wait [#allocation3], 1920  }
  0x22   :  { %1190 = vsyncadd [#allocation3], 4294965376 }
  0x23   :  { %36 = sfence }
  0x24   :  { %s66_s7 = sld [smem:[#allocation2]]  ;;  %s886_s8 = sld [smem:[#allocation2 + $0xf]]  ;;  %v1243_v0 = vld [vmem:[#allocation6] sm:$0xff]  ;;  %v1249_v1 = vld [vmem:[#allocation6 + $0x8] sm:$0xff]  ;;  %v1255_v3 = vld [vmem:[#allocation6 + $0x10] sm:$0xff] }
  0x25   :  { %s887_s9 = sld [smem:[#allocation2 + $0x1]]  ;;  %s888_s10 = sld [smem:[#allocation2 + $0x2]]  ;;  %v1258_v6 = vld [vmem:[#allocation6 + $0x18] sm:$0xff]  ;;  %v1267_v11 = vld [vmem:[#allocation6 + $0x20] sm:$0xff]  ;;  %v1278_v17 = vld [vmem:[#allocation6 + $0x28] sm:$0xff] }
  0x26   :  { %s889_s11 = sld [smem:[#allocation2 + $0x3]]  ;;  %s1245_s12 = sld [smem:[#allocation2 + $0x4]]  ;;  %v1290_v21 = vld [vmem:[#allocation6 + $0x30] sm:$0xff]  ;;  %v1292_v22 = vld [vmem:[#allocation6 + $0x38] sm:$0xff]  ;;  %v1305_v27 = vld [vmem:[#allocation6 + $0x40] sm:$0xff] }
  0x27   :  { %s1247_s13 = sld [smem:[#allocation2 + $0x5]]  ;;  %s1251_s1 = sld [smem:[#allocation2 + $0x6]]  ;;  %v1325_v41 = vld [vmem:[#allocation6 + $0x48] sm:$0xff]  ;;  %v1334_v46 = vld [vmem:[#allocation6 + $0x50] sm:$0xff]  ;;  %v1336_v47 = vld [vmem:[#allocation6 + $0x58] sm:$0xff] }
  0x28   :  { %s1253_s14 = sld [smem:[#allocation2 + $0x7]]  ;;  %s1260_s15 = sld [smem:[#allocation2 + $0x8]]  ;;  %v1345_v52 = vld [vmem:[#allocation6 + $0x60] sm:$0xff]  ;;  %v1347_v53 = vld [vmem:[#allocation6 + $0x68] sm:$0xff]  ;;  %v1349_v54 = vld [vmem:[#allocation6 + $0x70] sm:$0xff] }
  0x29   :  { %s1263_s16 = sld [smem:[#allocation2 + $0x9]]  ;;  %s1265_s17 = sld [smem:[#allocation2 + $0xa]] }
  0x2a   :  { %v67_v2 = vstv %s66_s7  ;;  %v70_v5 = vstv %s886_s8  ;;  %s1270_s18 = sld [smem:[#allocation2 + $0xb]]  ;;  %s901_s19 = sld [smem:[#allocation2 + $0x10]] }
  0x2b   :  { %v68_v4 = vmul.f32 %v67_v2, %v1243_v0  ;;  %v73_v7 = vstv %s887_s9  ;;  %v77_v10 = vstv %s888_s10  ;;  %s1274_s20 = sld [smem:[#allocation2 + $0x1f]]  ;;  %s1276_s21 = sld [smem:[#allocation2 + $0x11]] }
  0x2c   :  { %v74_v9 = vmul.f32 %v73_v7, %v1249_v1  ;;  %v78_v12 = vmul.f32 %v77_v10, %v1255_v3  ;;  %v81_v13 = vstv %s889_s11  ;;  %v85_v16 = vstv %s1245_s12  ;;  %s1281_s22 = sld [smem:[#allocation2 + $0x12]]  ;;  %s1283_s23 = sld [smem:[#allocation2 + $0x13]] }
  0x2d   :  { %v71_v8 = vadd.f32 %v70_v5, %v68_v4  ;;  %v82_v15 = vmul.f32 %v81_v13, %v1258_v6  ;;  %v89_v18 = vstv %s1247_s13  ;;  %v86_v20 = vmul.f32 %v85_v16, %v1267_v11  ;;  %s1286_s24 = sld [smem:[#allocation2 + $0xc]]  ;;  %s1296_s26 = sld [smem:[#allocation2 + $0xd]] }
  0x2e   :  { %s1288_s25 = sld [smem:[#allocation2 + $0x14]]  ;;  %v93_v23 = vstv %s1251_s1  ;;  %v97_v24 = vstv %s1253_s14  ;;  %s1298_s27 = sld [smem:[#allocation2 + $0xe]]  ;;  %v90_v26 = vmul.f32 %v89_v18, %v1278_v17  ;;  %v101_v28 = vstv %s1260_s15 }
  0x2f   :  { %v75_v14 = vadd.f32 %v74_v9, %v71_v8  ;;  %s1301_s28 = sld [smem:[#allocation2 + $0x15]]  ;;  %s1303_s29 = sld [smem:[#allocation2 + $0x16]]  ;;  %v94_v31 = vmul.f32 %v93_v23, %v1290_v21  ;;  %v98_v32 = vmul.f32 %v97_v24, %v1292_v22  ;;  %v102_v38 = vmul.f32 %v101_v28, %v1305_v27 }
  0x30   :  { %v129_v29 = vstv %s901_s19  ;;  %s1314_s30 = sld [smem:[#allocation2 + $0x17]]  ;;  %s1316_s3 = sld [smem:[#allocation2 + $0x18]]  ;;  %v105_v42 = vstv %s1263_s16  ;;  %v109_v43 = vstv %s1265_s17  ;;  %v113_v49 = vstv %s1270_s18 }
  0x31   :  { %v79_v19 = vadd.f32 %v78_v12, %v75_v14  ;;  %v130_v33 = vmul.f32 %v129_v29, %v1243_v0  ;;  %v132_v34 = vstv %s1274_s20  ;;  %v135_v35 = vstv %s1276_s21  ;;  %s1321_s5 = sld [smem:[#allocation2 + $0x19]]  ;;  %s1323_s6 = sld [smem:[#allocation2 + $0x20]] }
  0x32   :  { %v139_v36 = vstv %s1281_s22  ;;  %v136_v39 = vmul.f32 %v135_v35, %v1249_v1  ;;  %v143_v40 = vstv %s1283_s23  ;;  %s1330_s7 = sld [smem:[#allocation2 + $0x2f]]  ;;  %s1332_s8 = sld [smem:[#allocation2 + $0x21]]  ;;  %v106_v60 = vmul.f32 %v105_v42, %v1325_v41 }
  0x33   :  { %v83_v25 = vadd.f32 %v82_v15, %v79_v19  ;;  %v133_v44 = vadd.f32 %v132_v34, %v130_v33  ;;  %v140_v45 = vmul.f32 %v139_v36, %v1255_v3  ;;  %v117_v50 = vstv %s1286_s24  ;;  %s1341_s9 = sld [smem:[#allocation2 + $0x22]]  ;;  %s1343_s10 = sld [smem:[#allocation2 + $0x23]] }
  0x34   :  { %v147_v51 = vstv %s1288_s25  ;;  %v121_v55 = vstv %s1296_s26  ;;  %v125_v56 = vstv %s1298_s27  ;;  %v144_v58 = vmul.f32 %v143_v40, %v1258_v6  ;;  %s1357_s11 = sld [smem:[#allocation2 + $0x1a]]  ;;  %s1359_s12 = sld [smem:[#allocation2 + $0x24]] }
  0x35   :  { %v87_v30 = vadd.f32 %v86_v20, %v83_v25  ;;  %v137_v57 = vadd.f32 %v136_v39, %v133_v44  ;;  %v151_v61 = vstv %s1301_s28  ;;  %v155_v62 = vstv %s1303_s29  ;;  %s1364_s13 = sld [smem:[#allocation2 + $0x1b]]  ;;  %s1366_s1 = sld [smem:[#allocation2 + $0x1c]] }
  0x36   :  { %v110_v63 = vmul.f32 %v109_v43, %v1334_v46  ;;  %v114_v2 = vmul.f32 %v113_v49, %v1336_v47  ;;  %v148_v5 = vmul.f32 %v147_v51, %v1267_v11  ;;  %v1369_v8 = vmul.f32 %v117_v50, %v1345_v52  ;;  %s1377_s14 = sld [smem:[#allocation2 + $0x1d]]  ;;  %s1384_s16 = sld [smem:[#allocation2 + $0x26]] }
  0x37   :  { %v91_v37 = vadd.f32 %v90_v26, %v87_v30  ;;  %v141_v4 = vadd.f32 %v140_v45, %v137_v57  ;;  %v1372_v9 = vmul.f32 %v121_v55, %v1347_v53  ;;  %v1375_v10 = vmul.f32 %v125_v56, %v1349_v54  ;;  %s1379_s15 = sld [smem:[#allocation2 + $0x25]]  ;;  %s1389_s17 = sld [smem:[#allocation2 + $0x27]] }
  0x38   :  { %v152_v13 = vmul.f32 %v151_v61, %v1278_v17  ;;  %v156_v14 = vmul.f32 %v155_v62, %v1290_v21  ;;  %v159_v15 = vstv %s1314_s30  ;;  %v163_v18 = vstv %s1316_s3  ;;  %s1391_s18 = sld [smem:[#allocation2 + $0x28]]  ;;  %s1396_s19 = sld [smem:[#allocation2 + $0x1e]] }
  0x39   :  { %v95_v48 = vadd.f32 %v94_v31, %v91_v37  ;;  %v145_v12 = vadd.f32 %v144_v58, %v141_v4  ;;  %v167_v19 = vstv %s1321_s5  ;;  %v191_v20 = vstv %s1323_s6  ;;  %s1403_s20 = sld [smem:[#allocation2 + $0x29]]  ;;  %s1405_s21 = sld [smem:[#allocation2 + $0x30]] }
  0x3a   :  { %v192_v24 = vmul.f32 %v191_v20, %v1243_v0  ;;  %v194_v25 = vstv %s1330_s7  ;;  %v197_v26 = vstv %s1332_s8  ;;  %v201_v30 = vstv %s1341_s9  ;;  %s1411_s22 = sld [smem:[#allocation2 + $0x3f]]  ;;  %s1413_s23 = sld [smem:[#allocation2 + $0x31]] }
  0x3b   :  { %v99_v59 = vadd.f32 %v98_v32, %v95_v48  ;;  %v149_v23 = vadd.f32 %v148_v5, %v145_v12  ;;  %v198_v29 = vmul.f32 %v197_v26, %v1249_v1  ;;  %v205_v31 = vstv %s1343_s10  ;;  %s1417_s24 = sld [smem:[#allocation2 + $0x2a]]  ;;  %s1424_s26 = sld [smem:[#allocation2 + $0x33]] }
  0x3c   :  { %v160_v33 = vmul.f32 %v159_v15, %v1292_v22  ;;  %v195_v34 = vadd.f32 %v194_v25, %v192_v24  ;;  %v202_v35 = vmul.f32 %v201_v30, %v1255_v3  ;;  %v164_v36 = vmul.f32 %v163_v18, %v1305_v27  ;;  %s1419_s25 = sld [smem:[#allocation2 + $0x32]]  ;;  %s1426_s27 = sld [smem:[#allocation2 + $0x34]] }
  0x3d   :  { %v103_v7 = vadd.f32 %v102_v38, %v99_v59  ;;  %v153_v32 = vadd.f32 %v152_v13, %v149_v23  ;;  %v168_v37 = vmul.f32 %v167_v19, %v1325_v41  ;;  %v171_v38 = vstv %s1357_s11  ;;  %s1434_s28 = sld [smem:[#allocation2 + $0x2b]]  ;;  %s1438_s29 = sld [smem:[#allocation2 + $0x2c]] }
  0x3e   :  { %v209_v39 = vstv %s1359_s12  ;;  %v175_v42 = vstv %s1364_s13  ;;  %v199_v43 = vadd.f32 %v198_v29, %v195_v34  ;;  %v206_v44 = vmul.f32 %v205_v31, %v1258_v6  ;;  %s1446_s30 = sld [smem:[#allocation2 + $0x2d]]  ;;  %s1452_s5 = sld [smem:[#allocation2 + $0x36]] }
  0x3f   :  { %v107_v16 = vadd.f32 %v106_v60, %v103_v7  ;;  %v157_v40 = vadd.f32 %v156_v14, %v153_v32  ;;  %v179_v48 = vstv %s1366_s1  ;;  %v183_v49 = vstv %s1377_s14  ;;  %s1448_s3 = sld [smem:[#allocation2 + $0x35]]  ;;  %s1458_s6 = sld [smem:[#allocation2 + $0x37]] }
  0x40   :  { %v213_v50 = vstv %s1379_s15  ;;  %v203_v55 = vadd.f32 %v202_v35, %v199_v43  ;;  %v210_v56 = vmul.f32 %v209_v39, %v1267_v11  ;;  %v217_v57 = vstv %s1384_s16  ;;  %s1462_s7 = sld [smem:[#allocation2 + $0x38]]  ;;  %s1464_s8 = sld [smem:[#allocation2 + $0x2e]] }
  0x41   :  { %v111_v28 = vadd.f32 %v110_v63, %v107_v16  ;;  %v161_v51 = vadd.f32 %v160_v33, %v157_v40  ;;  %v172_v58 = vmul.f32 %v171_v38, %v1334_v46  ;;  %v176_v59 = vmul.f32 %v175_v42, %v1336_v47  ;;  %s1470_s9 = sld [smem:[#allocation2 + $0x39]]  ;;  %s1473_s10 = sld [smem:[#allocation2 + $0x40]] }
  0x42   :  { %v221_v60 = vstv %s1389_s17  ;;  %v225_v61 = vstv %s1391_s18  ;;  %v180_v63 = vmul.f32 %v179_v48, %v1345_v52  ;;  %v214_v4 = vmul.f32 %v213_v50, %v1278_v17  ;;  %s1481_s11 = sld [smem:[#allocation2 + $0x4f]]  ;;  %s1483_s12 = sld [smem:[#allocation2 + $0x41]] }
  0x43   :  { %v115_v45 = vadd.f32 %v114_v2, %v111_v28  ;;  %v165_v62 = vadd.f32 %v164_v36, %v161_v51  ;;  %v207_v2 = vadd.f32 %v206_v44, %v203_v55  ;;  %v1442_v7 = vmul.f32 %v183_v49, %v1347_v53  ;;  %s1487_s13 = sld [smem:[#allocation2 + $0x3a]]  ;;  %s1489_s1 = sld [smem:[#allocation2 + $0x3b]] }
  0x44   :  { %v187_v12 = vstv %s1396_s19  ;;  %v218_v13 = vmul.f32 %v217_v57, %v1290_v21  ;;  %v222_v16 = vmul.f32 %v221_v60, %v1292_v22  ;;  %v226_v18 = vmul.f32 %v225_v61, %v1305_v27  ;;  %s1495_s14 = sld [smem:[#allocation2 + $0x42]]  ;;  %s1497_s15 = sld [smem:[#allocation2 + $0x43]] }
  0x45   :  { %v119_v5 = vadd.f32 %v1369_v8, %v115_v45  ;;  %v169_v14 = vadd.f32 %v168_v37, %v165_v62  ;;  %v211_v15 = vadd.f32 %v210_v56, %v207_v2  ;;  %v229_v8 = vstv %s1403_s20  ;;  %s1500_s16 = sld [smem:[#allocation2 + $0x3c]]  ;;  %s1502_s17 = sld [smem:[#allocation2 + $0x3d]] }
  0x46   :  { %v253_v19 = vstv %s1405_s21  ;;  %v256_v20 = vstv %s1411_s22  ;;  %v259_v23 = vstv %s1413_s23  ;;  %v233_v26 = vstv %s1417_s24  ;;  %s1510_s18 = sld [smem:[#allocation2 + $0x3e]]  ;;  %s1512_s19 = sld [smem:[#allocation2 + $0x44]] }
  0x47   :  { %v173_v24 = vadd.f32 %v172_v58, %v169_v14  ;;  %v215_v25 = vadd.f32 %v214_v4, %v211_v15  ;;  %v254_v28 = vmul.f32 %v253_v19, %v1243_v0  ;;  %v260_v29 = vmul.f32 %v259_v23, %v1249_v1  ;;  %s1520_s20 = sld [smem:[#allocation2 + $0x45]]  ;;  %s1524_s21 = sld [smem:[#allocation2 + $0x46]] }
  0x48   :  { %v263_v30 = vstv %s1419_s25  ;;  %v267_v31 = vstv %s1424_s26  ;;  %v271_v32 = vstv %s1426_s27  ;;  %v123_v37 = vadd.f32 %v1372_v9, %v119_v5  ;;  %s1532_s22 = sld [smem:[#allocation2 + $0x47]]  ;;  %s1534_s23 = sld [smem:[#allocation2 + $0x48]] }
  0x49   :  { %v177_v33 = vadd.f32 %v176_v59, %v173_v24  ;;  %v219_v34 = vadd.f32 %v218_v13, %v215_v25  ;;  %v257_v35 = vadd.f32 %v256_v20, %v254_v28  ;;  %v264_v36 = vmul.f32 %v263_v30, %v1255_v3  ;;  %s1540_s24 = sld [smem:[#allocation2 + $0x49]]  ;;  %s1542_s25 = sld [smem:[#allocation2 + $0x50]] }
  0x4a   :  { %v1477_v38 = vmul.f32 %v187_v12, %v1349_v54  ;;  %v230_v39 = vmul.f32 %v229_v8, %v1325_v41  ;;  %v237_v40 = vstv %s1434_s28  ;;  %v241_v43 = vstv %s1438_s29  ;;  %s1546_s26 = sld [smem:[#allocation2 + $0x4a]]  ;;  %s1548_s27 = sld [smem:[#allocation2 + $0x5f]] }
  0x4b   :  { %v223_v42 = vadd.f32 %v222_v16, %v219_v34  ;;  %v261_v44 = vadd.f32 %v260_v29, %v257_v35  ;;  %v268_v45 = vmul.f32 %v267_v31, %v1258_v6  ;;  %v234_v9 = vmul.f32 %v233_v26, %v1334_v46  ;;  %s1554_s28 = sld [smem:[#allocation2 + $0x51]]  ;;  %s1556_s29 = sld [smem:[#allocation2 + $0x52]] }
  0x4c   :  { %v245_v48 = vstv %s1446_s30  ;;  %v272_v49 = vmul.f32 %v271_v32, %v1267_v11  ;;  %v275_v50 = vstv %s1448_s3  ;;  %v181_v51 = vadd.f32 %v180_v63, %v177_v33  ;;  %s1565_s30 = sld [smem:[#allocation2 + $0x53]]  ;;  %s1569_s3 = sld [smem:[#allocation2 + $0x54]] }
  0x4d   :  { %v227_v55 = vadd.f32 %v226_v18, %v223_v42  ;;  %v265_v56 = vadd.f32 %v264_v36, %v261_v44  ;;  %v279_v57 = vstv %s1452_s5  ;;  %v1505_v58 = vadd.f32 %v1375_v10, %v123_v37  ;;  %s1579_s5 = sld [smem:[#allocation2 + $0x4b]]  ;;  %s1863_s4 = sld [smem:[#allocation2 + $0xb4]] }
  0x4e   :  { %v238_v59 = vmul.f32 %v237_v40, %v1336_v47  ;;  %v242_v60 = vmul.f32 %v241_v43, %v1345_v52  ;;  %v283_v61 = vstv %s1458_s6  ;;  %v276_v2 = vmul.f32 %v275_v50, %v1278_v17  ;;  %s1581_s6 = sld [smem:[#allocation2 + $0x4c]]  ;;  %s1861_s0 = sld [smem:[#allocation2 + $0xb3]] }
  0x4f   :  { %v231_v62 = vadd.f32 %v230_v39, %v227_v55  ;;  %v269_v63 = vadd.f32 %v268_v45, %v265_v56  ;;  %v287_v4 = vstv %s1462_s7  ;;  %v246_v10 = vmul.f32 %v245_v48, %v1347_v53  ;;  %s1584_s7 = sld [smem:[#allocation2 + $0x4d]] }
  0x50   :  { %v249_v5 = vstv %s1464_s8  ;;  %v280_v12 = vmul.f32 %v279_v57, %v1290_v21  ;;  %v291_v13 = vstv %s1470_s9  ;;  %v185_v14 = vadd.f32 %v1442_v7, %v181_v51  ;;  %s1586_s8 = sld [smem:[#allocation2 + $0x55]]  ;;  %s1591_s9 = sld [smem:[#allocation2 + $0x4e]] }
  0x51   :  { %v235_v15 = vadd.f32 %v234_v9, %v231_v62  ;;  %v273_v16 = vadd.f32 %v272_v49, %v269_v63  ;;  %v284_v18 = vmul.f32 %v283_v61, %v1292_v22  ;;  %v288_v8 = vmul.f32 %v287_v4, %v1305_v27  ;;  %s1866_s2 = sld [smem:[#allocation2 + $0xb5]] }
  0x52   :  { %v315_v19 = vstv %s1473_s10  ;;  %v318_v20 = vstv %s1481_s11  ;;  %v321_v23 = vstv %s1483_s12  ;;  %v292_v28 = vmul.f32 %v291_v13, %v1325_v41  ;;  %s1594_s10 = sld [smem:[#allocation2 + $0x56]]  ;;  %s1598_s11 = sld [smem:[#allocation2 + $0x57]] }
  0x53   :  { %v239_v24 = vadd.f32 %v238_v59, %v235_v15  ;;  %v277_v25 = vadd.f32 %v276_v2, %v273_v16  ;;  %v316_v26 = vmul.f32 %v315_v19, %v1243_v0  ;;  %v322_v7 = vmul.f32 %v321_v23, %v1249_v1  ;;  %s1606_s12 = sld [smem:[#allocation2 + $0x58]] }
  0x54   :  { %v295_v29 = vstv %s1487_s13  ;;  %v325_v30 = vstv %s1495_s14  ;;  %v329_v31 = vstv %s1497_s15  ;;  %v299_v33 = vstv %s1489_s1  ;;  %s1612_s13 = sld [smem:[#allocation2 + $0x59]]  ;;  %s1614_s1 = sld [smem:[#allocation2 + $0x60]] }
  0x55   :  { %v281_v32 = vadd.f32 %v280_v12, %v277_v25  ;;  %v319_v34 = vadd.f32 %v318_v20, %v316_v26  ;;  %v326_v35 = vmul.f32 %v325_v30, %v1255_v3  ;;  %v303_v36 = vstv %s1500_s16  ;;  %s1619_s14 = sld [smem:[#allocation2 + $0x6f]]  ;;  %s1621_s15 = sld [smem:[#allocation2 + $0x61]] }
  0x56   :  { %v307_v37 = vstv %s1502_s17  ;;  %v311_v39 = vstv %s1510_s18  ;;  %v333_v40 = vstv %s1512_s19  ;;  %v243_v42 = vadd.f32 %v242_v60, %v239_v24  ;;  %s1626_s16 = sld [smem:[#allocation2 + $0x62]]  ;;  %s1628_s17 = sld [smem:[#allocation2 + $0x63]] }
  0x57   :  { %v285_v43 = vadd.f32 %v284_v18, %v281_v32  ;;  %v323_v44 = vadd.f32 %v322_v7, %v319_v34  ;;  %v330_v45 = vmul.f32 %v329_v31, %v1258_v6  ;;  %v1560_v9 = vadd.f32 %v1477_v38, %v185_v14  ;;  %s1635_s18 = sld [smem:[#allocation2 + $0x5a]]  ;;  %s1637_s19 = sld [smem:[#allocation2 + $0x64]] }
  0x58   :  { %v250_v48 = vmul.f32 %v249_v5, %v1349_v54  ;;  %v296_v49 = vmul.f32 %v295_v29, %v1334_v46  ;;  %v337_v50 = vstv %s1520_s20  ;;  %v334_v56 = vmul.f32 %v333_v40, %v1267_v11  ;;  %s1642_s20 = sld [smem:[#allocation2 + $0x5b]] }
  0x59   :  { %v289_v51 = vadd.f32 %v288_v8, %v285_v43  ;;  %v327_v55 = vadd.f32 %v326_v35, %v323_v44  ;;  %v341_v57 = vstv %s1524_s21  ;;  %v300_v59 = vmul.f32 %v299_v33, %v1336_v47  ;;  %s1649_s21 = sld [smem:[#allocation2 + $0x5c]] }
  0x5a   :  { %v304_v38 = vmul.f32 %v303_v36, %v1345_v52  ;;  %v1574_v60 = vmul.f32 %v307_v37, %v1347_v53  ;;  %v1577_v61 = vmul.f32 %v311_v39, %v1349_v54  ;;  %v247_v62 = vadd.f32 %v246_v10, %v243_v42 }
  0x5b   :  { %v293_v63 = vadd.f32 %v292_v28, %v289_v51  ;;  %v331_v2 = vadd.f32 %v330_v45, %v327_v55  ;;  %v338_v4 = vmul.f32 %v337_v50, %v1278_v17  ;;  %v342_v5 = vmul.f32 %v341_v57, %v1290_v21 }
  0x5c   :  { %v345_v12 = vstv %s1532_s22  ;;  %v349_v13 = vstv %s1534_s23  ;;  %v377_v14 = vstv %s1542_s25  ;;  %v353_v16 = vstv %s1540_s24  ;;  %s1651_s22 = sld [smem:[#allocation2 + $0x65]]  ;;  %s1663_s24 = sld [smem:[#allocation2 + $0x66]] }
  0x5d   :  { %v297_v10 = vadd.f32 %v296_v49, %v293_v63  ;;  %v335_v15 = vadd.f32 %v334_v56, %v331_v2  ;;  %v357_v18 = vstv %s1546_s26  ;;  %v378_v8 = vmul.f32 %v377_v14, %v1243_v0  ;;  %s1658_s23 = sld [smem:[#allocation2 + $0x5d]]  ;;  %s1665_s25 = sld [smem:[#allocation2 + $0x67]] }
  0x5e   :  { %v380_v19 = vstv %s1548_s27  ;;  %v383_v20 = vstv %s1554_s28  ;;  %v387_v23 = vstv %s1556_s29  ;;  %v346_v26 = vmul.f32 %v345_v12, %v1292_v22  ;;  %s1670_s26 = sld [smem:[#allocation2 + $0x5e]]  ;;  %s1675_s27 = sld [smem:[#allocation2 + $0x68]] }
  0x5f   :  { %v301_v24 = vadd.f32 %v300_v59, %v297_v10  ;;  %v339_v25 = vadd.f32 %v338_v4, %v335_v15  ;;  %v384_v7 = vmul.f32 %v383_v20, %v1249_v1  ;;  %v1608_v28 = vadd.f32 %v250_v48, %v247_v62  ;;  %s1679_s28 = sld [smem:[#allocation2 + $0x69]]  ;;  %s1684_s29 = sld [smem:[#allocation2 + $0x70]] }
  0x60   :  { %v381_v29 = vadd.f32 %v380_v19, %v378_v8  ;;  %v388_v30 = vmul.f32 %v387_v23, %v1255_v3  ;;  %v391_v31 = vstv %s1565_s30  ;;  %v350_v33 = vmul.f32 %v349_v13, %v1305_v27  ;;  %s1686_s30 = sld [smem:[#allocation2 + $0x7f]] }
  0x61   :  { %v343_v32 = vadd.f32 %v342_v5, %v339_v25  ;;  %v354_v34 = vmul.f32 %v353_v16, %v1325_v41  ;;  %v395_v35 = vstv %s1569_s3  ;;  %v361_v36 = vstv %s1579_s5  ;;  %s1693_s3 = sld [smem:[#allocation2 + $0x6a]]  ;;  %s1695_s5 = sld [smem:[#allocation2 + $0x71]] }
  0x62   :  { %v365_v37 = vstv %s1581_s6  ;;  %v385_v39 = vadd.f32 %v384_v7, %v381_v29  ;;  %v392_v40 = vmul.f32 %v391_v31, %v1258_v6  ;;  %v305_v42 = vadd.f32 %v304_v38, %v301_v24  ;;  %s1700_s6 = sld [smem:[#allocation2 + $0x72]] }
  0x63   :  { %v347_v43 = vadd.f32 %v346_v26, %v343_v32  ;;  %v369_v44 = vstv %s1584_s7  ;;  %v399_v45 = vstv %s1586_s8  ;;  %v373_v48 = vstv %s1591_s9  ;;  %s1702_s7 = sld [smem:[#allocation2 + $0x73]]  ;;  %s1711_s9 = sld [smem:[#allocation2 + $0x74]] }
  0x64   :  { %v389_v49 = vadd.f32 %v388_v30, %v385_v39  ;;  %v396_v50 = vmul.f32 %v395_v35, %v1267_v11  ;;  %v403_v51 = vstv %s1594_s10  ;;  %v358_v56 = vmul.f32 %v357_v18, %v1334_v46  ;;  %s1709_s8 = sld [smem:[#allocation2 + $0x6b]]  ;;  %s1716_s10 = sld [smem:[#allocation2 + $0x6c]] }
  0x65   :  { %v351_v55 = vadd.f32 %v350_v33, %v347_v43  ;;  %v362_v57 = vmul.f32 %v361_v36, %v1336_v47  ;;  %v407_v59 = vstv %s1598_s11  ;;  %v366_v38 = vmul.f32 %v365_v37, %v1345_v52  ;;  %s1718_s11 = sld [smem:[#allocation2 + $0x6d]] }
  0x66   :  { %v1646_v62 = vmul.f32 %v369_v44, %v1347_v53  ;;  %v393_v63 = vadd.f32 %v392_v40, %v389_v49  ;;  %v400_v2 = vmul.f32 %v399_v45, %v1278_v17  ;;  %v309_v4 = vadd.f32 %v1574_v60, %v305_v42 }
  0x67   :  { %v355_v5 = vadd.f32 %v354_v34, %v351_v55  ;;  %v1655_v12 = vmul.f32 %v373_v48, %v1349_v54  ;;  %v404_v13 = vmul.f32 %v403_v51, %v1290_v21  ;;  %v408_v10 = vmul.f32 %v407_v59, %v1292_v22 }
  0x68   :  { %v397_v14 = vadd.f32 %v396_v50, %v393_v63  ;;  %v411_v15 = vstv %s1606_s12  ;;  %v439_v16 = vstv %s1614_s1  ;;  %v415_v18 = vstv %s1612_s13  ;;  %s1723_s12 = sld [smem:[#allocation2 + $0x6e]]  ;;  %s1725_s13 = sld [smem:[#allocation2 + $0x75]] }
  0x69   :  { %v359_v60 = vadd.f32 %v358_v56, %v355_v5  ;;  %v440_v8 = vmul.f32 %v439_v16, %v1243_v0  ;;  %v442_v19 = vstv %s1619_s14  ;;  %v445_v23 = vstv %s1621_s15  ;;  %s1730_s1 = sld [smem:[#allocation2 + $0x76]]  ;;  %s1735_s14 = sld [smem:[#allocation2 + $0x77]] }
  0x6a   :  { %v401_v20 = vadd.f32 %v400_v2, %v397_v14  ;;  %v449_v24 = vstv %s1626_s16  ;;  %v453_v25 = vstv %s1628_s17  ;;  %v446_v29 = vmul.f32 %v445_v23, %v1249_v1  ;;  %s1745_s15 = sld [smem:[#allocation2 + $0x78]]  ;;  %s1756_s16 = sld [smem:[#allocation2 + $0x79]] }
  0x6b   :  { %v363_v26 = vadd.f32 %v362_v57, %v359_v60  ;;  %v443_v7 = vadd.f32 %v442_v19, %v440_v8  ;;  %v450_v30 = vmul.f32 %v449_v24, %v1255_v3  ;;  %v412_v32 = vmul.f32 %v411_v15, %v1305_v27  ;;  %s1763_s17 = sld [smem:[#allocation2 + $0x7a]] }
  0x6c   :  { %v405_v31 = vadd.f32 %v404_v13, %v401_v20  ;;  %v419_v33 = vstv %s1635_s18  ;;  %v457_v34 = vstv %s1637_s19  ;;  %v1689_v35 = vadd.f32 %v1577_v61, %v309_v4  ;;  %s1771_s18 = sld [smem:[#allocation2 + $0x7b]]  ;;  %s1775_s19 = sld [smem:[#allocation2 + $0x7c]] }
  0x6d   :  { %v416_v36 = vmul.f32 %v415_v18, %v1325_v41  ;;  %v447_v37 = vadd.f32 %v446_v29, %v443_v7  ;;  %v454_v39 = vmul.f32 %v453_v25, %v1258_v6  ;;  %v423_v42 = vstv %s1642_s20  ;;  %s1780_s20 = sld [smem:[#allocation2 + $0x7d]] }
  0x6e   :  { %v409_v40 = vadd.f32 %v408_v10, %v405_v31  ;;  %v427_v43 = vstv %s1649_s21  ;;  %v461_v44 = vstv %s1651_s22  ;;  %v367_v61 = vadd.f32 %v366_v38, %v363_v26  ;;  %s1785_s21 = sld [smem:[#allocation2 + $0x7e]]  ;;  %s1787_s22 = sld [smem:[#allocation2 + $0x80]] }
  0x6f   :  { %v431_v45 = vstv %s1658_s23  ;;  %v451_v48 = vadd.f32 %v450_v30, %v447_v37  ;;  %v458_v49 = vmul.f32 %v457_v34, %v1267_v11  ;;  %v420_v51 = vmul.f32 %v419_v33, %v1334_v46  ;;  %s1790_s23 = sld [smem:[#allocation2 + $0x8f]] }
  0x70   :  { %v413_v50 = vadd.f32 %v412_v32, %v409_v40  ;;  %v465_v55 = vstv %s1663_s24  ;;  %v469_v56 = vstv %s1665_s25  ;;  %v424_v57 = vmul.f32 %v423_v42, %v1336_v47  ;;  %s1793_s24 = sld [smem:[#allocation2 + $0x81]]  ;;  %s1795_s25 = sld [smem:[#allocation2 + $0x82]] }
  0x71   :  { %v428_v59 = vmul.f32 %v427_v43, %v1345_v52  ;;  %v455_v38 = vadd.f32 %v454_v39, %v451_v48  ;;  %v462_v63 = vmul.f32 %v461_v44, %v1278_v17  ;;  %v432_v4 = vmul.f32 %v431_v45, %v1347_v53 }
  0x72   :  { %v417_v2 = vadd.f32 %v416_v36, %v413_v50  ;;  %v435_v5 = vstv %s1670_s26  ;;  %v473_v13 = vstv %s1675_s27  ;;  %v371_v14 = vadd.f32 %v1646_v62, %v367_v61  ;;  %s1798_s26 = sld [smem:[#allocation2 + $0x83]]  ;;  %s1800_s27 = sld [smem:[#allocation2 + $0x84]] }
  0x73   :  { %v459_v10 = vadd.f32 %v458_v49, %v455_v38  ;;  %v466_v15 = vmul.f32 %v465_v55, %v1290_v21  ;;  %v470_v16 = vmul.f32 %v469_v56, %v1292_v22  ;;  %v477_v18 = vstv %s1679_s28  ;;  %s1803_s28 = sld [smem:[#allocation2 + $0x85]] }
  0x74   :  { %v421_v60 = vadd.f32 %v420_v51, %v417_v2  ;;  %v501_v8 = vstv %s1684_s29  ;;  %v504_v19 = vstv %s1686_s30  ;;  %v481_v23 = vstv %s1693_s3  ;;  %s1805_s29 = sld [smem:[#allocation2 + $0x86]]  ;;  %s1808_s30 = sld [smem:[#allocation2 + $0x90]] }
  0x75   :  { %v463_v20 = vadd.f32 %v462_v63, %v459_v10  ;;  %v502_v62 = vmul.f32 %v501_v8, %v1243_v0  ;;  %v507_v24 = vstv %s1695_s5  ;;  %v511_v7 = vstv %s1700_s6  ;;  %s1810_s3 = sld [smem:[#allocation2 + $0x9f]]  ;;  %s1813_s5 = sld [smem:[#allocation2 + $0x91]] }
  0x76   :  { %v425_v25 = vadd.f32 %v424_v57, %v421_v60  ;;  %v508_v26 = vmul.f32 %v507_v24, %v1249_v1  ;;  %v515_v29 = vstv %s1702_s7  ;;  %v474_v31 = vmul.f32 %v473_v13, %v1305_v27  ;;  %s1815_s6 = sld [smem:[#allocation2 + $0x92]]  ;;  %s1818_s7 = sld [smem:[#allocation2 + $0x93]] }
  0x77   :  { %v467_v30 = vadd.f32 %v466_v15, %v463_v20  ;;  %v505_v32 = vadd.f32 %v504_v19, %v502_v62  ;;  %v512_v33 = vmul.f32 %v511_v7, %v1255_v3  ;;  %v478_v34 = vmul.f32 %v477_v18, %v1325_v41 }
  0x78   :  { %v429_v0 = vadd.f32 %v428_v59, %v425_v25  ;;  %v482_v1 = vmul.f32 %v481_v23, %v1334_v46  ;;  %v519_v36 = vstv %s1711_s9  ;;  %v485_v39 = vstv %s1709_s8  ;;  %2085 = sst [smem:[#allocation11_spill]] %s1798_s26  ;;  %s1820_s8 = sld [smem:[#allocation2 + $0x94]] }
  0x79   :  { %v471_v37 = vadd.f32 %v470_v16, %v467_v30  ;;  %v509_v40 = vadd.f32 %v508_v26, %v505_v32  ;;  %v516_v42 = vmul.f32 %v515_v29, %v1258_v6  ;;  %v489_v43 = vstv %s1716_s10  ;;  %2086 = sst [smem:[#allocation12_spill]] %s1803_s28  ;;  %s1823_s9 = sld [smem:[#allocation2 + $0x95]] }
  0x7a   :  { %v493_v44 = vstv %s1718_s11  ;;  %v497_v61 = vstv %s1723_s12  ;;  %v523_v45 = vstv %s1725_s13  ;;  %v520_v49 = vmul.f32 %v519_v36, %v1267_v11  ;;  %s1825_s10 = sld [smem:[#allocation2 + $0x96]]  ;;  %s1828_s11 = sld [smem:[#allocation2 + $0xa0]] }
  0x7b   :  { %v475_v3 = vadd.f32 %v474_v31, %v471_v37  ;;  %v513_v48 = vadd.f32 %v512_v33, %v509_v40  ;;  %v527_v50 = vstv %s1730_s1  ;;  %v375_v51 = vadd.f32 %v1655_v12, %v371_v14  ;;  %s1830_s12 = sld [smem:[#allocation2 + $0xaf]]  ;;  %s1833_s13 = sld [smem:[#allocation2 + $0xa1]] }
  0x7c   :  { %v433_v55 = vadd.f32 %v432_v4, %v429_v0  ;;  %v436_v56 = vmul.f32 %v435_v5, %v1349_v54  ;;  %v531_v57 = vstv %s1735_s14  ;;  %v486_v59 = vmul.f32 %v485_v39, %v1336_v47  ;;  %s1835_s1 = sld [smem:[#allocation2 + $0xa2]]  ;;  %s1837_s14 = sld [smem:[#allocation2 + $0xa3]] }
  0x7d   :  { %v479_v6 = vadd.f32 %v478_v34, %v475_v3  ;;  %v517_v38 = vadd.f32 %v516_v42, %v513_v48  ;;  %v524_v63 = vmul.f32 %v523_v45, %v1278_v17  ;;  %v490_v2 = vmul.f32 %v489_v43, %v1345_v52 }
  0x7e   :  { %v494_v11 = vmul.f32 %v493_v44, %v1347_v53  ;;  %v498_v13 = vmul.f32 %v497_v61, %v1349_v54  ;;  %v528_v12 = vmul.f32 %v527_v50, %v1290_v21  ;;  %v532_v14 = vmul.f32 %v531_v57, %v1292_v22 }
  0x7f   :  { %v483_v4 = vadd.f32 %v482_v1, %v479_v6  ;;  %v521_v5 = vadd.f32 %v520_v49, %v517_v38  ;;  %v535_v10 = vstv %s1745_s15  ;;  %v437_v15 = vadd.f32 %v436_v56, %v433_v55  ;;  %s1839_s15 = sld [smem:[#allocation2 + $0xa4]] }
  0x80   :  { %v562_v17 = vsub.f32 0.0, %v1505_v58  ;;  %v567_v16 = vsub.f32 0.0, %v1560_v9  ;;  %v572_v60 = vsub.f32 0.0, %v1608_v28  ;;  %v577_v8 = vsub.f32 0.0, %v1689_v35 }
  0x81   :  { %v487_v18 = vadd.f32 %v486_v59, %v483_v4  ;;  %v525_v21 = vadd.f32 %v524_v63, %v521_v5  ;;  %v582_v19 = vsub.f32 0.0, %v375_v51  ;;  %v539_v20 = vstv %s1756_s16  ;;  %s1843_s16 = sld [smem:[#allocation2 + $0xa5]] }
  0x82   :  { %v563_v22 = vmul.f32 1.442695, %v562_v17  ;;  %v568_v23 = vmul.f32 1.442695, %v567_v16  ;;  %v573_v62 = vmul.f32 1.442695, %v572_v60  ;;  %v536_v58 = vmul.f32 %v535_v10, %v1305_v27 }
  0x83   :  { %v491_v24 = vadd.f32 %v490_v2, %v487_v18  ;;  %v529_v25 = vadd.f32 %v528_v12, %v525_v21  ;;  %v578_v9 = vmul.f32 1.442695, %v577_v8  ;;  %v543_v28 = vstv %s1763_s17  ;;  %s1845_s17 = sld [smem:[#allocation2 + $0xa6]] }
  0x84   :  { %1081 = vpow2.f32 %v563_v22  ;;  %v583_v26 = vmul.f32 1.442695, %v582_v19  ;;  %v587_v7 = vsub.f32 0.0, %v437_v15  ;;  %v540_v30 = vmul.f32 %v539_v20, %v1325_v41 }
  0x85   :  { %v495_v35 = vadd.f32 %v494_v11, %v491_v24  ;;  %v533_v29 = vadd.f32 %v532_v14, %v529_v25  ;;  %1083 = vpow2.f32 %v568_v23  ;;  %v547_v27 = vstv %s1771_s18  ;;  %s1850_s18 = sld [smem:[#allocation2 + $0xb0]] }
  0x86   :  { %1085 = vpow2.f32 %v573_v62  ;;  %v588_v31 = vmul.f32 1.442695, %v587_v7  ;;  %v544_v0 = vmul.f32 %v543_v28, %v1334_v46  ;;  %v551_v41 = vstv %s1775_s19  ;;  %s1852_s19 = sld [smem:[#allocation2 + $0xbf]] }
  0x87   :  { %v499_v32 = vadd.f32 %v498_v13, %v495_v35  ;;  %v537_v33 = vadd.f32 %v536_v58, %v533_v29  ;;  %1087 = vpow2.f32 %v578_v9  ;;  %v548_v1 = vmul.f32 %v547_v27, %v1336_v47 }
  0x88   :  { %1089 = vpow2.f32 %v583_v26  ;;  %v555_v46 = vstv %s1780_s20  ;;  %v552_v39 = vmul.f32 %v551_v41, %v1345_v52  ;;  %v559_v47 = vstv %s1785_s21  ;;  %s1855_s20 = sld [smem:[#allocation2 + $0xb1]]  ;;  %s1857_s21 = sld [smem:[#allocation2 + $0xb2]] }
  0x89   :  { %v541_v34 = vadd.f32 %v540_v30, %v537_v33  ;;  %1091 = vpow2.f32 %v588_v31  ;;  %v592_v36 = vsub.f32 0.0, %v499_v32  ;;  %v556_v43 = vmul.f32 %v555_v46, %v1347_v53 }
  0x8a   :  { %v560_v45 = vmul.f32 %v559_v47, %v1349_v54  ;;  %v603_v53 = vstv %s1787_s22  ;;  %v606_v50 = vstv %s1790_s23  ;;  %v609_v51 = vstv %s1793_s24  ;;  %s1938_s22 = sld [smem:[#allocation2 + $0xc4]]  ;;  %s1953_s24 = sld [smem:[#allocation2 + $0x87]] }
  0x8b   :  { %v545_v37 = vadd.f32 %v544_v0, %v541_v34  ;;  %v593_v40 = vmul.f32 1.442695, %v592_v36  ;;  %v613_v55 = vstv %s1795_s25  ;;  %v617_v6 = vstv %s1798_s26  ;;  %s1868_s26 = sld [smem:[#allocation2 + $0xb6]]  ;;  %s1955_s25 = sld [smem:[#allocation2 + $0x97]] }
  0x8c   :  { %v621_v63 = vstv %s1800_s27  ;;  %v625_v2 = vstv %s1803_s28  ;;  %v629_v4 = vstv %s1805_s29  ;;  %v637_v14 = vstv %s1808_s30  ;;  %s1874_s28 = sld [smem:[#allocation2 + $0xc0]]  ;;  %s1883_s30 = sld [smem:[#allocation2 + $0xcf]] }
  0x8d   :  { %v549_v42 = vadd.f32 %v548_v1, %v545_v37  ;;  %1093 = vpow2.f32 %v593_v40  ;;  %v640_v10 = vstv %s1810_s3  ;;  %v643_v17 = vstv %s1813_s5  ;;  %s1890_s3 = sld [smem:[#allocation2 + $0xc1]]  ;;  %s1892_s5 = sld [smem:[#allocation2 + $0xc2]] }
  0x8e   :  { %v1082_v52 = vpop.eup %1081  ;;  %v647_v16 = vstv %s1815_s6  ;;  %v651_v60 = vstv %s1818_s7  ;;  %v655_v18 = vstv %s1820_s8  ;;  %v659_v21 = vstv %s1823_s9  ;;  %s1919_s6 = sld [smem:[#allocation2 + $0xc3]]  ;;  %s1964_s27 = sld [smem:[#allocation2 + $0xa7]] }
  0x8f   :  { %v1084_v44 = vpop.eup %1083  ;;  %v553_v61 = vadd.f32 %v552_v39, %v549_v42  ;;  %v565_v3 = vadd.f32 1.0, %v1082_v52  ;;  %v663_v8 = vstv %s1825_s10  ;;  %v671_v22 = vstv %s1828_s11  ;;  %s1970_s7 = sld [smem:[#allocation2 + $0xb7]]  ;;  %s1972_s8 = sld [smem:[#allocation2 + $0xc6]] }
  0x90   :  { %v1086_v48 = vpop.eup %1085  ;;  %v570_v49 = vadd.f32 1.0, %v1084_v44  ;;  %v674_v23 = vstv %s1830_s12  ;;  %v677_v62 = vstv %s1833_s13  ;;  %v681_v25 = vstv %s1835_s1  ;;  %s1983_s9 = sld [smem:[#allocation2 + $0xc7]]  ;;  %s2013_s29 = sld [smem:[#allocation2 + $0x102]] }
  0x91   :  { %v1088_v56 = vpop.eup %1087  ;;  %v557_v54 = vadd.f32 %v556_v43, %v553_v61  ;;  %1095 = vrcp.f32 %v565_v3  ;;  %v575_v57 = vadd.f32 1.0, %v1086_v48  ;;  %v685_v58 = vstv %s1837_s14  ;;  %s2015_s10 = sld [smem:[#allocation2 + $0x103]]  ;;  %s2017_s11 = sld [smem:[#allocation2 + $0x104]] }
  0x92   :  { %v1090_v59 = vpop.eup %1089  ;;  %1097 = vrcp.f32 %v570_v49  ;;  %v580_v38 = vadd.f32 1.0, %v1088_v56  ;;  %v689_v9 = vstv %s1839_s15  ;;  %v693_v28 = vstv %s1843_s16  ;;  %s2019_s12 = sld [smem:[#allocation2 + $0x110]]  ;;  %s2021_s13 = sld [smem:[#allocation2 + $0x11f]] }
  0x93   :  { %v1092_v11 = vpop.eup %1091  ;;  %v561_v13 = vadd.f32 %v560_v45, %v557_v54  ;;  %1099 = vrcp.f32 %v575_v57  ;;  %v585_v12 = vadd.f32 1.0, %v1090_v59  ;;  %v697_v26 = vstv %s1845_s17  ;;  %s2023_s1 = sld [smem:[#allocation2 + $0x111]]  ;;  %s2025_s14 = sld [smem:[#allocation2 + $0x120]] }
  0x94   :  { %1101 = vrcp.f32 %v580_v38  ;;  %v590_v5 = vadd.f32 1.0, %v1092_v11  ;;  %v705_v7 = vstv %s1850_s18  ;;  %v708_v35 = vstv %s1852_s19  ;;  %s2027_s15 = sld [smem:[#allocation2 + $0x112]]  ;;  %s2029_s16 = sld [smem:[#allocation2 + $0x121]] }
  0x95   :  { %1103 = vrcp.f32 %v585_v12  ;;  %v597_v15 = vsub.f32 0.0, %v561_v13  ;;  %v711_v29 = vstv %s1855_s20  ;;  %v715_v30 = vstv %s1857_s21  ;;  %s2031_s17 = sld [smem:[#allocation2 + $0x113]]  ;;  %s2033_s18 = sld [smem:[#allocation2 + $0x12f]] }
  0x96   :  { %1105 = vrcp.f32 %v590_v5  ;;  %v719_v31 = vstv %s1861_s0  ;;  %v723_v32 = vstv %s1863_s4  ;;  %v727_v33 = vstv %s1866_s2  ;;  %s2007_s2 = sld [smem:[#allocation2 + $0x100]]  ;;  %s2009_s4 = sld [smem:[#allocation2 + $0x10f]] }
  0x97   :  { %v1094_v19 = vpop.eup %1093  ;;  %v598_v20 = vmul.f32 1.442695, %v597_v15  ;;  %v731_v0 = vstv %s1868_s26  ;;  %v739_v47 = vstv %s1874_s28  ;;  %v742_v49 = vstv %s1883_s30  ;;  %s1967_s28 = sld [smem:[#allocation2 + $0xc5]]  ;;  %s2011_s26 = sld [smem:[#allocation2 + $0x101]] }
  0x98   :  { %v595_v24 = vadd.f32 1.0, %v1094_v19  ;;  %v745_v59 = vstv %s1890_s3  ;;  %v749_v38 = vstv %s1892_s5  ;;  %s2035_s19 = sld [smem:[#allocation2 + $0x122]]  ;;  %s2037_s20 = sld [smem:[#allocation2 + $0x123]] }
  0x99   :  { %1107 = vpow2.f32 %v598_v20  ;;  %s2039_s21 = sld [smem:[#allocation2 + $0x114]]  ;;  %s1197_s3 = smov [#allocation7]  }
  0x9a   :  { %1109 = vrcp.f32 %v595_v24  ;;  %s2041_s30 = sld [smem:[#allocation2 + $0x124]]  ;;  %s873_s5 = sshll.u32 %s1197_s3, 4  ;;  %s874_s5 = int_to_ptr.vmem [resolvable:$true] %s873_s5 }
  0x9b   :  { %v1898_v27 = vpop.eup %1095  ;;  %s1165_s0 = scalar_lea.vmem %s874_s5, 384  ;;  %p1170_p0 = scmp.lt.s32.totalorder %s874_s5, %s874_s5 }
  0x9c   :  { %v1904_v41 = vpop.eup %1097  ;;  %v604_v34 = vmul.f32 %v1898_v27, %v603_v53  ;;  %v638_v1 = vmul.f32 %v1898_v27, %v637_v14  ;;  %v672_v36 = vmul.f32 %v1898_v27, %v671_v22  ;;  %v706_v48 = vmul.f32 %v1898_v27, %v705_v7  ;;  %p1166_p13 = scmp.ne.s32.totalorder %s874_s5, %s1165_s0  ;;  %p1171_p1 = scmp.lt.s32.totalorder %s1165_s0, %s1165_s0 }
  0x9d   :  { %v1911_v46 = vpop.eup %1099  ;;  %v610_v37 = vmul.f32 %v1904_v41, %v609_v51  ;;  %v644_v39 = vmul.f32 %v1904_v41, %v643_v17  ;;  %v678_v40 = vmul.f32 %v1904_v41, %v677_v62  ;;  %v753_v62 = vstv %s1919_s6 }
  0x9e   :  { %v1921_v42 = vpop.eup %1101  ;;  %v607_v43 = vadd.f32 %v606_v50, %v604_v34  ;;  %v614_v52 = vmul.f32 %v1911_v46, %v613_v55  ;;  %v641_v44 = vadd.f32 %v640_v10, %v638_v1  ;;  %v648_v61 = vmul.f32 %v1911_v46, %v647_v16  ;;  %p1172_p2 = por %p1171_p1, %p1170_p0 }
  0x9f   :  { %v1929_v45 = vpop.eup %1103  ;;  %v675_v3 = vadd.f32 %v674_v23, %v672_v36  ;;  %v682_v53 = vmul.f32 %v1911_v46, %v681_v25  ;;  %v618_v50 = vmul.f32 %v1921_v42, %v617_v6  ;;  %v652_v55 = vmul.f32 %v1921_v42, %v651_v60 }
  0xa0   :  { %v611_v51 = vadd.f32 %v610_v37, %v607_v43  ;;  %v645_v56 = vadd.f32 %v644_v39, %v641_v44  ;;  %v686_v57 = vmul.f32 %v1921_v42, %v685_v58  ;;  %v1943_v11 = vpop.eup %1105  ;;  %v622_v12 = vmul.f32 %v1929_v45, %v621_v63  ;;  %p1173_p3 = pnand %p1172_p2, %p1166_p13 }
  0xa1   :  { %v679_v54 = vadd.f32 %v678_v40, %v675_v3  ;;  %v712_v6 = vmul.f32 %v1904_v41, %v711_v29  ;;  %v656_v10 = vmul.f32 %v1929_v45, %v655_v18  ;;  %v690_v17 = vmul.f32 %v1929_v45, %v689_v9 }
  0xa2   :  { %v615_v13 = vadd.f32 %v614_v52, %v611_v51  ;;  %v649_v5 = vadd.f32 %v648_v61, %v645_v56  ;;  %v709_v16 = vadd.f32 %v708_v35, %v706_v48  ;;  %v716_v63 = vmul.f32 %v1911_v46, %v715_v30 }
  0xa3   :  { %v1108_v14 = vpop.eup %1107  ;;  %v683_v15 = vadd.f32 %v682_v53, %v679_v54  ;;  %v626_v22 = vmul.f32 %v1943_v11, %v625_v2  ;;  %v660_v18 = vmul.f32 %v1943_v11, %v659_v21  ;;  %v720_v9 = vmul.f32 %v1921_v42, %v719_v31 }
  0xa4   :  { %v600_v60 = vadd.f32 1.0, %v1108_v14  ;;  %v619_v19 = vadd.f32 %v618_v50, %v615_v13  ;;  %v653_v20 = vadd.f32 %v652_v55, %v649_v5  ;;  %v1110_v24 = vpop.eup %1109  ;;  %v713_v58 = vadd.f32 %v712_v6, %v709_v16 }
  0xa5   :  { %v687_v23 = vadd.f32 %v686_v57, %v683_v15  ;;  %v694_v7 = vmul.f32 %v1943_v11, %v693_v28  ;;  %v740_v35 = vmul.f32 %v1898_v27, %v739_v47  ;;  %v724_v30 = vmul.f32 %v1929_v45, %v723_v32 }
  0xa6   :  { %1111 = vrcp.f32 %v600_v60  ;;  %v623_v25 = vadd.f32 %v622_v12, %v619_v19  ;;  %v657_v2 = vadd.f32 %v656_v10, %v653_v20  ;;  %v717_v29 = vadd.f32 %v716_v63, %v713_v58 }
  0xa7   :  { %v691_v21 = vadd.f32 %v690_v17, %v687_v23  ;;  %v746_v31 = vmul.f32 %v1904_v41, %v745_v59  ;;  %v757_v34 = vstv %s1938_s22  ;;  %v630_v1 = vmul.f32 %v1110_v24, %v629_v4 }
  0xa8   :  { %v664_v36 = vmul.f32 %v1110_v24, %v663_v8  ;;  %v743_v28 = vadd.f32 %v742_v49, %v740_v35  ;;  %v750_v27 = vmul.f32 %v1911_v46, %v749_v38  ;;  %v627_v37 = vadd.f32 %v626_v22, %v623_v25 }
  0xa9   :  { %v698_v32 = vmul.f32 %v1110_v24, %v697_v26  ;;  %v721_v39 = vadd.f32 %v720_v9, %v717_v29  ;;  %v728_v41 = vmul.f32 %v1943_v11, %v727_v33  ;;  %v661_v40 = vadd.f32 %v660_v18, %v657_v2 }
  0xaa   :  { %v695_v47 = vadd.f32 %v694_v7, %v691_v21  ;;  %v747_v43 = vadd.f32 %v746_v31, %v743_v28  ;;  %v754_v4 = vmul.f32 %v1921_v42, %v753_v62  ;;  %v633_v52 = vstv %s1953_s24 }
  0xab   :  { %v725_v8 = vadd.f32 %v724_v30, %v721_v39  ;;  %v732_v44 = vmul.f32 %v1110_v24, %v731_v0  ;;  %v667_v46 = vstv %s1955_s25  ;;  %v701_v61 = vstv %s1964_s27 }
  0xac   :  { %v751_v3 = vadd.f32 %v750_v27, %v747_v43  ;;  %v761_v53 = vstv %s1967_s28  ;;  %v735_v48 = vstv %s1970_s7  ;;  %v758_v49 = vmul.f32 %v1929_v45, %v757_v34 }
  0xad   :  { %v729_v26 = vadd.f32 %v728_v41, %v725_v8  ;;  %v765_v51 = vstv %s1972_s8  ;;  %v631_v33 = vadd.f32 %v630_v1, %v627_v37  ;;  %v665_v50 = vadd.f32 %v664_v36, %v661_v40 }
  0xae   :  { %v699_v56 = vadd.f32 %v698_v32, %v695_v47  ;;  %v755_v55 = vadd.f32 %v754_v4, %v751_v3  ;;  %v762_v57 = vmul.f32 %v1943_v11, %v761_v53  ;;  %v769_v59 = vstv %s1983_s9 }
  0xaf   :  { %v733_v42 = vadd.f32 %v732_v44, %v729_v26  ;;  %v766_v6 = vmul.f32 %v1110_v24, %v765_v51  ;;  %v798_v36 = vstv %s2007_s2  ;;  %v801_v28 = vstv %s2009_s4 }
  0xb0   :  { %v1112_v54 = vpop.eup %1111  ;;  %v759_v5 = vadd.f32 %v758_v49, %v755_v55  ;;  %v804_v27 = vstv %s2011_s26  ;;  %v808_v37 = vstv %s2013_s29  ;;  %v820_v32 = vstv %s2019_s12 }
  0xb1   :  { %v634_v0 = vmul.f32 %v1112_v54, %v633_v52  ;;  %v668_v38 = vmul.f32 %v1112_v54, %v667_v46  ;;  %v702_v13 = vmul.f32 %v1112_v54, %v701_v61  ;;  %v736_v12 = vmul.f32 %v1112_v54, %v735_v48 }
  0xb2   :  { %v763_v17 = vadd.f32 %v762_v57, %v759_v5  ;;  %v770_v16 = vmul.f32 %v1112_v54, %v769_v59  ;;  %v842_v39 = vstv %s2025_s14  ;;  %v812_v41 = vstv %s2015_s10 }
  0xb3   :  { %v635_v14 = vadd.f32 %v634_v0, %v631_v33  ;;  %v669_v10 = vadd.f32 %v668_v38, %v665_v50  ;;  %v703_v15 = vadd.f32 %v702_v13, %v699_v56  ;;  %v737_v45 = vadd.f32 %v736_v12, %v733_v42 }
  0xb4   :  { %v767_v22 = vadd.f32 %v766_v6, %v763_v17  ;;  %v816_v40 = vstv %s2017_s11  ;;  %v826_v47 = vstv %s2023_s1  ;;  %v848_v43 = vstv %s2029_s16 }
  0xb5   :  { %v772_v60 = vsub.f32 0.0, %v635_v14  ;;  %v777_v19 = vsub.f32 0.0, %v669_v10  ;;  %v782_v20 = vsub.f32 0.0, %v703_v15  ;;  %v787_v63 = vsub.f32 0.0, %v737_v45 }
  0xb6   :  { %v771_v62 = vadd.f32 %v770_v16, %v767_v22  ;;  %v823_v52 = vstv %s2021_s13  ;;  %v830_v8 = vstv %s2027_s15  ;;  %v834_v44 = vstv %s2031_s17 }
  0xb7   :  { %v773_v18 = vmul.f32 1.442695, %v772_v60  ;;  %v778_v11 = vmul.f32 1.442695, %v777_v19  ;;  %v783_v23 = vmul.f32 1.442695, %v782_v20  ;;  %v845_v46 = vstv %s2033_s18 }
  0xb8   :  { %v788_v25 = vmul.f32 1.442695, %v787_v63  ;;  %v792_v58 = vsub.f32 0.0, %v771_v62  ;;  %v852_v48 = vstv %s2035_s19  ;;  %v856_v56 = vstv %s2037_s20 }
  0xb9   :  { %1113 = vpow2.f32 %v773_v18  ;;  %v838_v0 = vstv %s2039_s21  ;;  %v860_v12 = vstv %s2041_s30 }
  0xba   :  { %1115 = vpow2.f32 %v778_v11  ;;  %v793_v24 = vmul.f32 1.442695, %v792_v58 }
  0xbb   :  { %1117 = vpow2.f32 %v783_v23 }
  0xbc   :  { %1119 = vpow2.f32 %v788_v25 }
  0xbd   :  { %1121 = vpow2.f32 %v793_v24 }
  0xc3   :  { %v1114_v9 = vpop.eup %1113 }
  0xc4   :  { %v1116_v2 = vpop.eup %1115  ;;  %v775_v21 = vadd.f32 1.0, %v1114_v9 }
  0xc5   :  { %v1118_v7 = vpop.eup %1117  ;;  %v780_v35 = vadd.f32 1.0, %v1116_v2 }
  0xc6   :  { %v1120_v29 = vpop.eup %1119  ;;  %1123 = vrcp.f32 %v775_v21  ;;  %v785_v30 = vadd.f32 1.0, %v1118_v7 }
  0xc7   :  { %1125 = vrcp.f32 %v780_v35  ;;  %v790_v31 = vadd.f32 1.0, %v1120_v29  ;;  %v1122_v34 = vpop.eup %1121 }
  0xc8   :  { %1127 = vrcp.f32 %v785_v30  ;;  %v795_v1 = vadd.f32 1.0, %v1122_v34 }
  0xc9   :  { %1129 = vrcp.f32 %v790_v31 }
  0xca   :  { %1131 = vrcp.f32 %v795_v1 }
  0xd0   :  { %v1124_v4 = vpop.eup %1123 }
  0xd1   :  { %v1126_v61 = vpop.eup %1125  ;;  %v799_v3 = vmul.f32 %v1124_v4, %v798_v36  ;;  %v821_v53 = vmul.f32 %v1124_v4, %v820_v32  ;;  %v843_v26 = vmul.f32 %v1124_v4, %v842_v39 }
  0xd2   :  { %v1128_v49 = vpop.eup %1127  ;;  %v805_v51 = vmul.f32 %v1126_v61, %v804_v27  ;;  %v827_v33 = vmul.f32 %v1126_v61, %v826_v47  ;;  %v849_v50 = vmul.f32 %v1126_v61, %v848_v43 }
  0xd3   :  { %v1130_v55 = vpop.eup %1129  ;;  %v802_v54 = vadd.f32 %v801_v28, %v799_v3  ;;  %v809_v42 = vmul.f32 %v1128_v49, %v808_v37  ;;  %v824_v57 = vadd.f32 %v823_v52, %v821_v53  ;;  %v831_v59 = vmul.f32 %v1128_v49, %v830_v8 }
  0xd4   :  { %v846_v38 = vadd.f32 %v845_v46, %v843_v26  ;;  %v853_v13 = vmul.f32 %v1128_v49, %v852_v48  ;;  %v1132_v5 = vpop.eup %1131  ;;  %v813_v14 = vmul.f32 %v1130_v55, %v812_v41  ;;  %v835_v15 = vmul.f32 %v1130_v55, %v834_v44 }
  0xd5   :  { %v806_v6 = vadd.f32 %v805_v51, %v802_v54  ;;  %v828_v10 = vadd.f32 %v827_v33, %v824_v57  ;;  %v857_v17 = vmul.f32 %v1130_v55, %v856_v56  ;;  %v817_v60 = vmul.f32 %v1132_v5, %v816_v40 }
  0xd6   :  { %v850_v45 = vadd.f32 %v849_v50, %v846_v38  ;;  %v839_v20 = vmul.f32 %v1132_v5, %v838_v0  ;;  %v861_v22 = vmul.f32 %v1132_v5, %v860_v12 }
  0xd7   :  { %v810_v16 = vadd.f32 %v809_v42, %v806_v6  ;;  %v832_v19 = vadd.f32 %v831_v59, %v828_v10 }
  0xd8   :  { %v854_v63 = vadd.f32 %v853_v13, %v850_v45 }
  0xd9   :  { %v814_v18 = vadd.f32 %v813_v14, %v810_v16  ;;  %v836_v11 = vadd.f32 %v835_v15, %v832_v19 }
  0xda   :  { %v858_v23 = vadd.f32 %v857_v17, %v854_v63 }
  0xdb   :  { %v818_v62 = vadd.f32 %v817_v60, %v814_v18  ;;  %v840_v25 = vadd.f32 %v839_v20, %v836_v11 }
  0xdc   :  { %v862_v58 = vadd.f32 %v861_v22, %v858_v23 }
  0xdd   :  { %863 = vst [vmem:[#allocation7] sm:$0xff] %v818_v62  ;;  %865 = vst [vmem:[#allocation7 + $0x8] sm:$0xff] %v840_v25 }
  0xde   :  { %867 = vst [vmem:[#allocation7 + $0x10] sm:$0xff] %v862_v58 }
  0xdf   :  { %1176 = shalt.err (!%p1173_p3)
}
  0xe0   :  { %s2089_s23 = sld [smem:[#allocation13_spill]] }
  0xe6   :  { %s1177_s24 = scalar_lea.hbm %s2089_s23, 384 }
  0xe7   :  { %p1178_p4 = scmp.ne.s32.totalorder %s2089_s23, %s1177_s24  ;;  %p1181_p5 = scmp.lt.u32.totalorder %s1177_s24, %s2089_s23 }
  0xe9   :  { %p1183_p6 = pnand %p1181_p5, %p1178_p4 }
  0xeb   :  { %1186 = shalt.err (!%p1183_p6)
}
  0xec   :  { %s2090_s8 = smov 8   ;;  %s2091_s9 = smov 128  }
  0xed   :  { %879 = dma.vmem_to_hbm [thread:$0]  %s874_s5, 384, %s2089_s23, [#allocation4], %s2091_s9, %s2091_s9, %s2090_s8  }
  0xee   :  { %1191 = dma.done.wait [#allocation4], 384  }
  0xef   :  { %1192 = vsyncadd [#allocation4], 4294966912 }
  0xf0   :  { %883 = vsyncpa [#allocation3], 1 }
  0xf1   :  { %884 = vsyncpa [#allocation4], 1 }
  0xf2   :  { %885 = vsyncpa [#allocation5], 1 }

</bundles_post_ra>
